<compile_context>
chip_gen: v5e
topology: v5e:2x2
jax: 0.10.0
libtpu: 0.0.40
codegen_flags: <defaults>
</compile_context>

<pallas_src>
import jax
import jax.numpy as jnp
from jax import lax
from jax.experimental import pallas as pl
from jax.experimental.pallas import tpu as pltpu


# ---------------------------------------------------------------------------
# Kernel
# ---------------------------------------------------------------------------
def lstm_kernel(x_ref, w_ih_ref, w_hh_ref, b_ref, w_out_ref, b_out_ref,
                out_ref, xp_sc):
    """Single-layer LSTM recurrence + final linear for one batch block.

    Shapes:
      x_ref     (T, Bb, I)   f32   time-major batch block
      w_ih_ref  (I, 4*Hp)    f32   fused, gate-order [i,f,o,g], lane-padded
      w_hh_ref  (Hp, 4*Hp)   bf16  fused, gate-order [i,f,o,g], zero-padded
      b_ref     (1, 4*Hp)    f32   b_ih + b_hh, same layout
      w_out_ref (1, Hp)      f32   final linear weights (zero-padded)
      b_out_ref (1, 1)       f32
      out_ref   (Bb, 1)      f32
      xp_sc     (T, Bb, 4*Hp) f32  precomputed input projection + bias
    """
    T, Bb, I = x_ref.shape
    Hp = w_hh_ref.shape[0]

    # ---- input projection + bias for every timestep, hoisted off the serial
    # recurrence.  I is tiny & static -> VPU broadcast work, no MXU.
    # TODO(synk): if input_size grows past a few, replace this with one MXU
    # dot over the collapsed (T*Bb, I) @ (I, 4*Hp) instead of I VPU passes.
    x = x_ref[...]                                     # (T, Bb, I)
    w_ih = w_ih_ref[...]                               # (I, 4*Hp)
    acc = x[:, :, 0:1] * w_ih[0:1, :]                  # (T, Bb, 4*Hp)
    for i in range(1, I):
        acc = acc + x[:, :, i:i + 1] * w_ih[i:i + 1, :]
    xp_sc[...] = acc + b_ref[...]                      # bias folded in once

    w_hh = w_hh_ref[...]                               # loop-invariant bf16 RHS

    # ---- serial recurrence: one fused bf16 MXU dot per step; h/c live in
    # registers (loop carry), so there is no VMEM round trip per step.
    # Zero-padded gate lanes give preactivation 0 -> g = tanh(0) = 0, so the
    # padded lanes of h/c stay exactly 0 and never pollute the real lanes.
    def step(t, carry):
        h, c = carry                                                   # (Bb, Hp)
        gates = xp_sc[t] + jnp.dot(h.astype(jnp.bfloat16), w_hh,
                                   preferred_element_type=jnp.float32)  # (Bb, 4*Hp)
        # gate layout (repacked): [i | f | o | g] -> one contiguous sigmoid
        # slab and one tanh slab.
        ifo = jax.nn.sigmoid(gates[:, :3 * Hp])
        i_t = ifo[:, 0 * Hp:1 * Hp]
        f_t = ifo[:, 1 * Hp:2 * Hp]
        o_t = ifo[:, 2 * Hp:3 * Hp]
        g_t = jnp.tanh(gates[:, 3 * Hp:])
        c_new = f_t * c + i_t * g_t
        h_new = o_t * jnp.tanh(c_new)
        return (h_new, c_new)

    h0 = jnp.zeros((Bb, Hp), jnp.float32)
    c0 = jnp.zeros((Bb, Hp), jnp.float32)
    # T is small & static: fully unroll so the scheduler overlaps xp loads /
    # EUP activations of step t+1 with the MXU drain of step t.
    h_T, _ = lax.fori_loop(0, T, step, (h0, c0), unroll=True)

    # ---- final linear (H -> 1): VPU multiply + lane reduction, no MXU tail.
    out_ref[...] = jnp.sum(h_T * w_out_ref[...], axis=-1,
                           keepdims=True) + b_out_ref[...]


# ---------------------------------------------------------------------------
# Parameter construction / packing
# ---------------------------------------------------------------------------
def make_torch_params(key, input_size=1, hidden_size=50, output_size=1):
    """Deterministic params with exact nn.LSTM / nn.Linear shapes."""
    ks = jax.random.split(key, 6)
    H, I, O = hidden_size, input_size, output_size
    bound = 1.0 / jnp.sqrt(jnp.float32(H))
    return {
        "w_ih": jax.random.uniform(ks[0], (4 * H, I), jnp.float32, -bound, bound),
        "w_hh": jax.random.uniform(ks[1], (4 * H, H), jnp.float32, -bound, bound),
        "b_ih": jax.random.uniform(ks[2], (4 * H,), jnp.float32, -bound, bound),
        "b_hh": jax.random.uniform(ks[3], (4 * H,), jnp.float32, -bound, bound),
        "w_lin": jax.random.uniform(ks[4], (O, H), jnp.float32, -bound, bound),
        "b_lin": jax.random.uniform(ks[5], (O,), jnp.float32, -bound, bound),
    }


def pack_params(tp, Hp):
    """Re-layout PyTorch-shaped weights into the fused, lane-padded kernel
    layout (gate order [i, f, o, g]; W_hh cast to bf16).  All padding is
    zero-filled, so the math is unchanged up to the bf16 recurrent matmul."""
    w_ih, w_hh = tp["w_ih"], tp["w_hh"]
    b = tp["b_ih"] + tp["b_hh"]
    w_lin, b_lin = tp["w_lin"], tp["b_lin"]

    four_h, I = w_ih.shape
    H = four_h // 4
    assert w_lin.shape[0] == 1, "kernel's reduction-based head assumes output_size == 1"

    # PyTorch gate layout along 4H is [i, f, g, o]; repack as [i, f, o, g] so
    # one contiguous sigmoid covers the first three slabs.
    order = (0, 1, 3, 2)

    w_ih_g = jnp.transpose(w_ih.reshape(4, H, I), (0, 2, 1))   # (4, I, H)
    w_hh_g = jnp.transpose(w_hh.reshape(4, H, H), (0, 2, 1))   # (4, H, H)
    b_g = b.reshape(4, H)

    def fuse(w_g, rows, rows_pad):
        # (4, rows, H) -> (rows_pad, 4*Hp), each gate zero-padded to Hp cols.
        w_pad = jnp.pad(w_g, ((0, 0), (0, rows_pad - rows), (0, Hp - H)))
        return jnp.concatenate([w_pad[g] for g in order], axis=-1)

    return {
        "w_ih": fuse(w_ih_g, I, I),                                   # (I, 4*Hp) f32
        "w_hh": fuse(w_hh_g, H, Hp).astype(jnp.bfloat16),             # (Hp, 4*Hp) bf16
        "b": jnp.concatenate(
            [jnp.pad(b_g[g], (0, Hp - H)) for g in order]
        ).reshape(1, 4 * Hp),                                         # (1, 4*Hp)
        "w_out": jnp.pad(w_lin[0], (0, Hp - H)).reshape(1, Hp),       # (1, Hp)
        "b_out": b_lin.reshape(1, 1),                                 # (1, 1)
    }


# ---------------------------------------------------------------------------
# Wrapper
# ---------------------------------------------------------------------------
def lstm_model_forward(x, torch_params, *, batch_block=256):
    """x: (B, T, I) float32, batch_first (PyTorch convention). Returns (B,).

    batch_block: per-grid-step batch tile.  Larger batches fill the MXU M
    dimension (up to 256 rows on v6e/v7x) and are sharded across TensorCores
    via the "parallel" grid axis; small batches collapse to a single block.
    """
    B, T, I = x.shape
    H = torch_params["w_hh"].shape[1]
    Hp = ((H + 127) // 128) * 128               # per-gate lane padding
    batch_block = max(8, (batch_block // 8) * 8)
    Bb = min(((B + 7) // 8) * 8, batch_block)   # batch tile (multiple of 8)
    Bp = ((B + Bb - 1) // Bb) * Bb              # padded batch (multiple of Bb)
    nb = Bp // Bb

    kp = pack_params(torch_params, Hp)

    x_tm = jnp.transpose(x, (1, 0, 2)).astype(jnp.float32)      # (T, B, I)
    x_tm = jnp.pad(x_tm, ((0, 0), (0, Bp - B), (0, 0)))         # (T, Bp, I)

    out = pl.pallas_call(
        lstm_kernel,
        out_shape=jax.ShapeDtypeStruct((Bp, 1), jnp.float32),
        grid=(nb,),
        in_specs=[
            pl.BlockSpec((T, Bb, I), lambda b: (0, b, 0)),        # x batch block
            pl.BlockSpec((I, 4 * Hp), lambda b: (0, 0)),          # W_ih (resident)
            pl.BlockSpec((Hp, 4 * Hp), lambda b: (0, 0)),         # W_hh (resident)
            pl.BlockSpec((1, 4 * Hp), lambda b: (0, 0)),          # bias
            pl.BlockSpec((1, Hp), lambda b: (0, 0)),              # W_out
            pl.BlockSpec((1, 1), lambda b: (0, 0)),               # b_out
        ],
        out_specs=pl.BlockSpec((Bb, 1), lambda b: (b, 0)),
        scratch_shapes=[
            pltpu.VMEM((T, Bb, 4 * Hp), jnp.float32),   # x projection (+bias)
        ],
        compiler_params=pltpu.CompilerParams(
            dimension_semantics=("parallel",),          # batch blocks independent
            vmem_limit_bytes=32 * 1024 * 1024,
        ),
    )(x_tm, kp["w_ih"], kp["w_hh"], kp["b"], kp["w_out"], kp["b_out"])

    return out[:B, 0]                       # drop batch padding + squeeze(1)


# ---------------------------------------------------------------------------
# Pure-JAX reference of the exact PyTorch math (checks packing too)
# ---------------------------------------------------------------------------
def reference_forward(x, tp):
    B, T, I = x.shape
    H = tp["w_hh"].shape[1]
    w_ih, w_hh = tp["w_ih"], tp["w_hh"]
    b = tp["b_ih"] + tp["b_hh"]
    h = jnp.zeros((B, H), jnp.float32)
    c = jnp.zeros((B, H), jnp.float32)
    for t in range(T):
        g = x[:, t, :] @ w_ih.T + h @ w_hh.T + b           # (B, 4H)
        i_t = jax.nn.sigmoid(g[:, 0 * H:1 * H])
        f_t = jax.nn.sigmoid(g[:, 1 * H:2 * H])
        g_t = jnp.tanh(g[:, 2 * H:3 * H])
        o_t = jax.nn.sigmoid(g[:, 3 * H:4 * H])
        c = f_t * c + i_t * g_t
        h = o_t * jnp.tanh(c)
    return (h @ tp["w_lin"].T + tp["b_lin"])[:, 0]


if __name__ == "__main__":
    key = jax.random.PRNGKey(0)
    k_x, k_p = jax.random.split(key)

    B, T, I, H, O = 4, 8, 1, 50, 1
    x = jax.random.normal(k_x, (B, T, I), dtype=jnp.float32)
    torch_params = make_torch_params(k_p, input_size=I, hidden_size=H, output_size=O)

    y = jax.block_until_ready(lstm_model_forward(x, torch_params))
    y_ref = reference_forward(x, torch_params)

    assert y.shape == (B,)
    # Tolerance relaxed vs. the pure-f32 version: the recurrent matmul runs
    # in bf16 (f32 accumulation), accumulating ~1e-3 error over T=8 steps.
    assert jnp.allclose(y, y_ref, atol=2e-2, rtol=2e-2), (y, y_ref)
    print("KERNEL_OK")
</pallas_src>

<mosaic_0001>
module attributes {stable_mosaic.version = 11 : i64} {
  func.func @lstm_kernel(%arg0: i32, %arg1: memref<8x8x1xf32, #tpu.memory_space<vmem>>, %arg2: memref<1x512xf32, #tpu.memory_space<vmem>>, %arg3: memref<128x512xbf16, #tpu.memory_space<vmem>>, %arg4: memref<1x512xf32, #tpu.memory_space<vmem>>, %arg5: memref<1x128xf32, #tpu.memory_space<vmem>>, %arg6: memref<1x1xf32, #tpu.memory_space<vmem>>, %arg7: memref<8x1xf32, #tpu.memory_space<vmem>>, %arg8: memref<8x8x512xf32, #tpu.memory_space<vmem>>) attributes {dimension_semantics = [#tpu.dimension_semantics<parallel>], iteration_bounds = array<i64: 1>, scalar_prefetch = 0 : i64, scratch_operands = 1 : i64, tpu.core_type = #tpu.core_type<tc>, window_params = [{transform_indices = @transform_0, window_bounds = array<i64: 8, 8, 1>}, {pipeline_mode = #tpu.pipeline_mode<synchronous>, transform_indices = @transform_1, window_bounds = array<i64: 1, 512>}, {pipeline_mode = #tpu.pipeline_mode<synchronous>, transform_indices = @transform_2, window_bounds = array<i64: 128, 512>}, {pipeline_mode = #tpu.pipeline_mode<synchronous>, transform_indices = @transform_3, window_bounds = array<i64: 1, 512>}, {pipeline_mode = #tpu.pipeline_mode<synchronous>, transform_indices = @transform_4, window_bounds = array<i64: 1, 128>}, {pipeline_mode = #tpu.pipeline_mode<synchronous>, transform_indices = @transform_5, window_bounds = array<i64: 1, 1>}, {transform_indices = @transform_6, window_bounds = array<i64: 8, 1>}]} {
    %c0 = arith.constant 0 : index
    %c0_0 = arith.constant 0 : index
    %c0_1 = arith.constant 0 : index
    %0 = vector.load %arg1[%c0, %c0_0, %c0_1] : memref<8x8x1xf32, #tpu.memory_space<vmem>>, vector<8x8x1xf32>
    %c0_2 = arith.constant 0 : index
    %c0_3 = arith.constant 0 : index
    %1 = vector.load %arg2[%c0_2, %c0_3] : memref<1x512xf32, #tpu.memory_space<vmem>>, vector<1x512xf32>
    %2 = vector.shape_cast %1 : vector<1x512xf32> to vector<1x1x512xf32>
    %3 = vector.broadcast %0 : vector<8x8x1xf32> to vector<8x8x512xf32>
    %4 = vector.broadcast %2 : vector<1x1x512xf32> to vector<8x8x512xf32>
    %5 = arith.mulf %3, %4 : vector<8x8x512xf32>
    %c0_4 = arith.constant 0 : index
    %c0_5 = arith.constant 0 : index
    %6 = vector.load %arg4[%c0_4, %c0_5] : memref<1x512xf32, #tpu.memory_space<vmem>>, vector<1x512xf32>
    %7 = vector.shape_cast %6 : vector<1x512xf32> to vector<1x1x512xf32>
    %8 = vector.broadcast %7 : vector<1x1x512xf32> to vector<8x8x512xf32>
    %9 = arith.addf %5, %8 : vector<8x8x512xf32>
    %c0_6 = arith.constant 0 : index
    %c0_7 = arith.constant 0 : index
    %c0_8 = arith.constant 0 : index
    %10 = vector.load %arg8[%c0_6, %c0_7, %c0_8] : memref<8x8x512xf32, #tpu.memory_space<vmem>>, vector<8x8x512xf32>
    tpu.vector_store %arg8[%c0_6, %c0_7, %c0_8], %9 {strides = array<i32>} : memref<8x8x512xf32, #tpu.memory_space<vmem>>, vector<8x8x512xf32>,
    %c0_9 = arith.constant 0 : index
    %c0_10 = arith.constant 0 : index
    %11 = vector.load %arg3[%c0_9, %c0_10] : memref<128x512xbf16, #tpu.memory_space<vmem>>, vector<128x512xbf16>
    %cst = arith.constant 0.000000e+00 : f32
    %12 = vector.broadcast %cst : f32 to vector<8x128xf32>
    %cst_11 = arith.constant 0.000000e+00 : f32
    %13 = vector.broadcast %cst_11 : f32 to vector<8x128xf32>
    %c0_i32 = arith.constant 0 : i32
    %14 = arith.index_cast %c0_i32 : i32 to index
    %c0_12 = arith.constant 0 : index
    %c0_13 = arith.constant 0 : index
    %15 = vector.load %arg8[%14, %c0_12, %c0_13] : memref<8x8x512xf32, #tpu.memory_space<vmem>>, vector<1x8x512xf32>
    %16 = vector.shape_cast %15 : vector<1x8x512xf32> to vector<8x512xf32>
    %17 = arith.truncf %12 : vector<8x128xf32> to vector<8x128xbf16>
    %cst_14 = arith.constant dense<0.000000e+00> : vector<8x512xf32>
    %18 = tpu.matmul %17, %11, %cst_14 {dimension_numbers = #tpu.dot_dimension_numbers<[1], [0], [0], [1], [0, 0, 1, 1], [], []>} : vector<8x128xbf16>, vector<128x512xbf16>, vector<8x512xf32> -> vector<8x512xf32>
    %19 = arith.addf %16, %18 : vector<8x512xf32>
    %20 = vector.extract_strided_slice %19 {offsets = [0, 0], sizes = [8, 384], strides = [1, 1]} : vector<8x512xf32> to vector<8x384xf32>
    %21 = arith.negf %20 : vector<8x384xf32>
    %22 = math.exp %21 : vector<8x384xf32>
    %cst_15 = arith.constant 1.000000e+00 : f32
    %23 = vector.broadcast %cst_15 : f32 to vector<8x384xf32>
    %24 = arith.addf %23, %22 : vector<8x384xf32>
    %25 = arith.divf %23, %24 : vector<8x384xf32>
    %26 = vector.extract_strided_slice %25 {offsets = [0, 0], sizes = [8, 128], strides = [1, 1]} : vector<8x384xf32> to vector<8x128xf32>
    %27 = vector.extract_strided_slice %25 {offsets = [0, 128], sizes = [8, 128], strides = [1, 1]} : vector<8x384xf32> to vector<8x128xf32>
    %28 = vector.extract_strided_slice %25 {offsets = [0, 256], sizes = [8, 128], strides = [1, 1]} : vector<8x384xf32> to vector<8x128xf32>
    %29 = vector.extract_strided_slice %19 {offsets = [0, 384], sizes = [8, 128], strides = [1, 1]} : vector<8x512xf32> to vector<8x128xf32>
    %30 = math.tanh %29 : vector<8x128xf32>
    %31 = arith.mulf %27, %13 : vector<8x128xf32>
    %32 = arith.mulf %26, %30 : vector<8x128xf32>
    %33 = arith.addf %31, %32 : vector<8x128xf32>
    %34 = math.tanh %33 : vector<8x128xf32>
    %35 = arith.mulf %28, %34 : vector<8x128xf32>
    %c1_i32 = arith.constant 1 : i32
    %36 = arith.index_cast %c1_i32 : i32 to index
    %c0_16 = arith.constant 0 : index
    %c0_17 = arith.constant 0 : index
    %37 = vector.load %arg8[%36, %c0_16, %c0_17] : memref<8x8x512xf32, #tpu.memory_space<vmem>>, vector<1x8x512xf32>
    %38 = vector.shape_cast %37 : vector<1x8x512xf32> to vector<8x512xf32>
    %39 = arith.truncf %35 : vector<8x128xf32> to vector<8x128xbf16>
    %cst_18 = arith.constant dense<0.000000e+00> : vector<8x512xf32>
    %40 = tpu.matmul %39, %11, %cst_18 {dimension_numbers = #tpu.dot_dimension_numbers<[1], [0], [0], [1], [0, 0, 1, 1], [], []>} : vector<8x128xbf16>, vector<128x512xbf16>, vector<8x512xf32> -> vector<8x512xf32>
    %41 = arith.addf %38, %40 : vector<8x512xf32>
    %42 = vector.extract_strided_slice %41 {offsets = [0, 0], sizes = [8, 384], strides = [1, 1]} : vector<8x512xf32> to vector<8x384xf32>
    %43 = arith.negf %42 : vector<8x384xf32>
    %44 = math.exp %43 : vector<8x384xf32>
    %cst_19 = arith.constant 1.000000e+00 : f32
    %45 = vector.broadcast %cst_19 : f32 to vector<8x384xf32>
    %46 = arith.addf %45, %44 : vector<8x384xf32>
    %47 = arith.divf %45, %46 : vector<8x384xf32>
    %48 = vector.extract_strided_slice %47 {offsets = [0, 0], sizes = [8, 128], strides = [1, 1]} : vector<8x384xf32> to vector<8x128xf32>
    %49 = vector.extract_strided_slice %47 {offsets = [0, 128], sizes = [8, 128], strides = [1, 1]} : vector<8x384xf32> to vector<8x128xf32>
    %50 = vector.extract_strided_slice %47 {offsets = [0, 256], sizes = [8, 128], strides = [1, 1]} : vector<8x384xf32> to vector<8x128xf32>
    %51 = vector.extract_strided_slice %41 {offsets = [0, 384], sizes = [8, 128], strides = [1, 1]} : vector<8x512xf32> to vector<8x128xf32>
    %52 = math.tanh %51 : vector<8x128xf32>
    %53 = arith.mulf %49, %33 : vector<8x128xf32>
    %54 = arith.mulf %48, %52 : vector<8x128xf32>
    %55 = arith.addf %53, %54 : vector<8x128xf32>
    %56 = math.tanh %55 : vector<8x128xf32>
    %57 = arith.mulf %50, %56 : vector<8x128xf32>
    %c2_i32 = arith.constant 2 : i32
    %58 = arith.index_cast %c2_i32 : i32 to index
    %c0_20 = arith.constant 0 : index
    %c0_21 = arith.constant 0 : index
    %59 = vector.load %arg8[%58, %c0_20, %c0_21] : memref<8x8x512xf32, #tpu.memory_space<vmem>>, vector<1x8x512xf32>
    %60 = vector.shape_cast %59 : vector<1x8x512xf32> to vector<8x512xf32>
    %61 = arith.truncf %57 : vector<8x128xf32> to vector<8x128xbf16>
    %cst_22 = arith.constant dense<0.000000e+00> : vector<8x512xf32>
    %62 = tpu.matmul %61, %11, %cst_22 {dimension_numbers = #tpu.dot_dimension_numbers<[1], [0], [0], [1], [0, 0, 1, 1], [], []>} : vector<8x128xbf16>, vector<128x512xbf16>, vector<8x512xf32> -> vector<8x512xf32>
    %63 = arith.addf %60, %62 : vector<8x512xf32>
    %64 = vector.extract_strided_slice %63 {offsets = [0, 0], sizes = [8, 384], strides = [1, 1]} : vector<8x512xf32> to vector<8x384xf32>
    %65 = arith.negf %64 : vector<8x384xf32>
    %66 = math.exp %65 : vector<8x384xf32>
    %cst_23 = arith.constant 1.000000e+00 : f32
    %67 = vector.broadcast %cst_23 : f32 to vector<8x384xf32>
    %68 = arith.addf %67, %66 : vector<8x384xf32>
    %69 = arith.divf %67, %68 : vector<8x384xf32>
    %70 = vector.extract_strided_slice %69 {offsets = [0, 0], sizes = [8, 128], strides = [1, 1]} : vector<8x384xf32> to vector<8x128xf32>
    %71 = vector.extract_strided_slice %69 {offsets = [0, 128], sizes = [8, 128], strides = [1, 1]} : vector<8x384xf32> to vector<8x128xf32>
    %72 = vector.extract_strided_slice %69 {offsets = [0, 256], sizes = [8, 128], strides = [1, 1]} : vector<8x384xf32> to vector<8x128xf32>
    %73 = vector.extract_strided_slice %63 {offsets = [0, 384], sizes = [8, 128], strides = [1, 1]} : vector<8x512xf32> to vector<8x128xf32>
    %74 = math.tanh %73 : vector<8x128xf32>
    %75 = arith.mulf %71, %55 : vector<8x128xf32>
    %76 = arith.mulf %70, %74 : vector<8x128xf32>
    %77 = arith.addf %75, %76 : vector<8x128xf32>
    %78 = math.tanh %77 : vector<8x128xf32>
    %79 = arith.mulf %72, %78 : vector<8x128xf32>
    %c3_i32 = arith.constant 3 : i32
    %80 = arith.index_cast %c3_i32 : i32 to index
    %c0_24 = arith.constant 0 : index
    %c0_25 = arith.constant 0 : index
    %81 = vector.load %arg8[%80, %c0_24, %c0_25] : memref<8x8x512xf32, #tpu.memory_space<vmem>>, vector<1x8x512xf32>
    %82 = vector.shape_cast %81 : vector<1x8x512xf32> to vector<8x512xf32>
    %83 = arith.truncf %79 : vector<8x128xf32> to vector<8x128xbf16>
    %cst_26 = arith.constant dense<0.000000e+00> : vector<8x512xf32>
    %84 = tpu.matmul %83, %11, %cst_26 {dimension_numbers = #tpu.dot_dimension_numbers<[1], [0], [0], [1], [0, 0, 1, 1], [], []>} : vector<8x128xbf16>, vector<128x512xbf16>, vector<8x512xf32> -> vector<8x512xf32>
    %85 = arith.addf %82, %84 : vector<8x512xf32>
    %86 = vector.extract_strided_slice %85 {offsets = [0, 0], sizes = [8, 384], strides = [1, 1]} : vector<8x512xf32> to vector<8x384xf32>
    %87 = arith.negf %86 : vector<8x384xf32>
    %88 = math.exp %87 : vector<8x384xf32>
    %cst_27 = arith.constant 1.000000e+00 : f32
    %89 = vector.broadcast %cst_27 : f32 to vector<8x384xf32>
    %90 = arith.addf %89, %88 : vector<8x384xf32>
    %91 = arith.divf %89, %90 : vector<8x384xf32>
    %92 = vector.extract_strided_slice %91 {offsets = [0, 0], sizes = [8, 128], strides = [1, 1]} : vector<8x384xf32> to vector<8x128xf32>
    %93 = vector.extract_strided_slice %91 {offsets = [0, 128], sizes = [8, 128], strides = [1, 1]} : vector<8x384xf32> to vector<8x128xf32>
    %94 = vector.extract_strided_slice %91 {offsets = [0, 256], sizes = [8, 128], strides = [1, 1]} : vector<8x384xf32> to vector<8x128xf32>
    %95 = vector.extract_strided_slice %85 {offsets = [0, 384], sizes = [8, 128], strides = [1, 1]} : vector<8x512xf32> to vector<8x128xf32>
    %96 = math.tanh %95 : vector<8x128xf32>
    %97 = arith.mulf %93, %77 : vector<8x128xf32>
    %98 = arith.mulf %92, %96 : vector<8x128xf32>
    %99 = arith.addf %97, %98 : vector<8x128xf32>
    %100 = math.tanh %99 : vector<8x128xf32>
    %101 = arith.mulf %94, %100 : vector<8x128xf32>
    %c4_i32 = arith.constant 4 : i32
    %102 = arith.index_cast %c4_i32 : i32 to index
    %c0_28 = arith.constant 0 : index
    %c0_29 = arith.constant 0 : index
    %103 = vector.load %arg8[%102, %c0_28, %c0_29] : memref<8x8x512xf32, #tpu.memory_space<vmem>>, vector<1x8x512xf32>
    %104 = vector.shape_cast %103 : vector<1x8x512xf32> to vector<8x512xf32>
    %105 = arith.truncf %101 : vector<8x128xf32> to vector<8x128xbf16>
    %cst_30 = arith.constant dense<0.000000e+00> : vector<8x512xf32>
    %106 = tpu.matmul %105, %11, %cst_30 {dimension_numbers = #tpu.dot_dimension_numbers<[1], [0], [0], [1], [0, 0, 1, 1], [], []>} : vector<8x128xbf16>, vector<128x512xbf16>, vector<8x512xf32> -> vector<8x512xf32>
    %107 = arith.addf %104, %106 : vector<8x512xf32>
    %108 = vector.extract_strided_slice %107 {offsets = [0, 0], sizes = [8, 384], strides = [1, 1]} : vector<8x512xf32> to vector<8x384xf32>
    %109 = arith.negf %108 : vector<8x384xf32>
    %110 = math.exp %109 : vector<8x384xf32>
    %cst_31 = arith.constant 1.000000e+00 : f32
    %111 = vector.broadcast %cst_31 : f32 to vector<8x384xf32>
    %112 = arith.addf %111, %110 : vector<8x384xf32>
    %113 = arith.divf %111, %112 : vector<8x384xf32>
    %114 = vector.extract_strided_slice %113 {offsets = [0, 0], sizes = [8, 128], strides = [1, 1]} : vector<8x384xf32> to vector<8x128xf32>
    %115 = vector.extract_strided_slice %113 {offsets = [0, 128], sizes = [8, 128], strides = [1, 1]} : vector<8x384xf32> to vector<8x128xf32>
    %116 = vector.extract_strided_slice %113 {offsets = [0, 256], sizes = [8, 128], strides = [1, 1]} : vector<8x384xf32> to vector<8x128xf32>
    %117 = vector.extract_strided_slice %107 {offsets = [0, 384], sizes = [8, 128], strides = [1, 1]} : vector<8x512xf32> to vector<8x128xf32>
    %118 = math.tanh %117 : vector<8x128xf32>
    %119 = arith.mulf %115, %99 : vector<8x128xf32>
    %120 = arith.mulf %114, %118 : vector<8x128xf32>
    %121 = arith.addf %119, %120 : vector<8x128xf32>
    %122 = math.tanh %121 : vector<8x128xf32>
    %123 = arith.mulf %116, %122 : vector<8x128xf32>
    %c5_i32 = arith.constant 5 : i32
    %124 = arith.index_cast %c5_i32 : i32 to index
    %c0_32 = arith.constant 0 : index
    %c0_33 = arith.constant 0 : index
    %125 = vector.load %arg8[%124, %c0_32, %c0_33] : memref<8x8x512xf32, #tpu.memory_space<vmem>>, vector<1x8x512xf32>
    %126 = vector.shape_cast %125 : vector<1x8x512xf32> to vector<8x512xf32>
    %127 = arith.truncf %123 : vector<8x128xf32> to vector<8x128xbf16>
    %cst_34 = arith.constant dense<0.000000e+00> : vector<8x512xf32>
    %128 = tpu.matmul %127, %11, %cst_34 {dimension_numbers = #tpu.dot_dimension_numbers<[1], [0], [0], [1], [0, 0, 1, 1], [], []>} : vector<8x128xbf16>, vector<128x512xbf16>, vector<8x512xf32> -> vector<8x512xf32>
    %129 = arith.addf %126, %128 : vector<8x512xf32>
    %130 = vector.extract_strided_slice %129 {offsets = [0, 0], sizes = [8, 384], strides = [1, 1]} : vector<8x512xf32> to vector<8x384xf32>
    %131 = arith.negf %130 : vector<8x384xf32>
    %132 = math.exp %131 : vector<8x384xf32>
    %cst_35 = arith.constant 1.000000e+00 : f32
    %133 = vector.broadcast %cst_35 : f32 to vector<8x384xf32>
    %134 = arith.addf %133, %132 : vector<8x384xf32>
    %135 = arith.divf %133, %134 : vector<8x384xf32>
    %136 = vector.extract_strided_slice %135 {offsets = [0, 0], sizes = [8, 128], strides = [1, 1]} : vector<8x384xf32> to vector<8x128xf32>
    %137 = vector.extract_strided_slice %135 {offsets = [0, 128], sizes = [8, 128], strides = [1, 1]} : vector<8x384xf32> to vector<8x128xf32>
    %138 = vector.extract_strided_slice %135 {offsets = [0, 256], sizes = [8, 128], strides = [1, 1]} : vector<8x384xf32> to vector<8x128xf32>
    %139 = vector.extract_strided_slice %129 {offsets = [0, 384], sizes = [8, 128], strides = [1, 1]} : vector<8x512xf32> to vector<8x128xf32>
    %140 = math.tanh %139 : vector<8x128xf32>
    %141 = arith.mulf %137, %121 : vector<8x128xf32>
    %142 = arith.mulf %136, %140 : vector<8x128xf32>
    %143 = arith.addf %141, %142 : vector<8x128xf32>
    %144 = math.tanh %143 : vector<8x128xf32>
    %145 = arith.mulf %138, %144 : vector<8x128xf32>
    %c6_i32 = arith.constant 6 : i32
    %146 = arith.index_cast %c6_i32 : i32 to index
    %c0_36 = arith.constant 0 : index
    %c0_37 = arith.constant 0 : index
    %147 = vector.load %arg8[%146, %c0_36, %c0_37] : memref<8x8x512xf32, #tpu.memory_space<vmem>>, vector<1x8x512xf32>
    %148 = vector.shape_cast %147 : vector<1x8x512xf32> to vector<8x512xf32>
    %149 = arith.truncf %145 : vector<8x128xf32> to vector<8x128xbf16>
    %cst_38 = arith.constant dense<0.000000e+00> : vector<8x512xf32>
    %150 = tpu.matmul %149, %11, %cst_38 {dimension_numbers = #tpu.dot_dimension_numbers<[1], [0], [0], [1], [0, 0, 1, 1], [], []>} : vector<8x128xbf16>, vector<128x512xbf16>, vector<8x512xf32> -> vector<8x512xf32>
    %151 = arith.addf %148, %150 : vector<8x512xf32>
    %152 = vector.extract_strided_slice %151 {offsets = [0, 0], sizes = [8, 384], strides = [1, 1]} : vector<8x512xf32> to vector<8x384xf32>
    %153 = arith.negf %152 : vector<8x384xf32>
    %154 = math.exp %153 : vector<8x384xf32>
    %cst_39 = arith.constant 1.000000e+00 : f32
    %155 = vector.broadcast %cst_39 : f32 to vector<8x384xf32>
    %156 = arith.addf %155, %154 : vector<8x384xf32>
    %157 = arith.divf %155, %156 : vector<8x384xf32>
    %158 = vector.extract_strided_slice %157 {offsets = [0, 0], sizes = [8, 128], strides = [1, 1]} : vector<8x384xf32> to vector<8x128xf32>
    %159 = vector.extract_strided_slice %157 {offsets = [0, 128], sizes = [8, 128], strides = [1, 1]} : vector<8x384xf32> to vector<8x128xf32>
    %160 = vector.extract_strided_slice %157 {offsets = [0, 256], sizes = [8, 128], strides = [1, 1]} : vector<8x384xf32> to vector<8x128xf32>
    %161 = vector.extract_strided_slice %151 {offsets = [0, 384], sizes = [8, 128], strides = [1, 1]} : vector<8x512xf32> to vector<8x128xf32>
    %162 = math.tanh %161 : vector<8x128xf32>
    %163 = arith.mulf %159, %143 : vector<8x128xf32>
    %164 = arith.mulf %158, %162 : vector<8x128xf32>
    %165 = arith.addf %163, %164 : vector<8x128xf32>
    %166 = math.tanh %165 : vector<8x128xf32>
    %167 = arith.mulf %160, %166 : vector<8x128xf32>
    %c7_i32 = arith.constant 7 : i32
    %168 = arith.index_cast %c7_i32 : i32 to index
    %c0_40 = arith.constant 0 : index
    %c0_41 = arith.constant 0 : index
    %169 = vector.load %arg8[%168, %c0_40, %c0_41] : memref<8x8x512xf32, #tpu.memory_space<vmem>>, vector<1x8x512xf32>
    %170 = vector.shape_cast %169 : vector<1x8x512xf32> to vector<8x512xf32>
    %171 = arith.truncf %167 : vector<8x128xf32> to vector<8x128xbf16>
    %cst_42 = arith.constant dense<0.000000e+00> : vector<8x512xf32>
    %172 = tpu.matmul %171, %11, %cst_42 {dimension_numbers = #tpu.dot_dimension_numbers<[1], [0], [0], [1], [0, 0, 1, 1], [], []>} : vector<8x128xbf16>, vector<128x512xbf16>, vector<8x512xf32> -> vector<8x512xf32>
    %173 = arith.addf %170, %172 : vector<8x512xf32>
    %174 = vector.extract_strided_slice %173 {offsets = [0, 0], sizes = [8, 384], strides = [1, 1]} : vector<8x512xf32> to vector<8x384xf32>
    %175 = arith.negf %174 : vector<8x384xf32>
    %176 = math.exp %175 : vector<8x384xf32>
    %cst_43 = arith.constant 1.000000e+00 : f32
    %177 = vector.broadcast %cst_43 : f32 to vector<8x384xf32>
    %178 = arith.addf %177, %176 : vector<8x384xf32>
    %179 = arith.divf %177, %178 : vector<8x384xf32>
    %180 = vector.extract_strided_slice %179 {offsets = [0, 0], sizes = [8, 128], strides = [1, 1]} : vector<8x384xf32> to vector<8x128xf32>
    %181 = vector.extract_strided_slice %179 {offsets = [0, 128], sizes = [8, 128], strides = [1, 1]} : vector<8x384xf32> to vector<8x128xf32>
    %182 = vector.extract_strided_slice %179 {offsets = [0, 256], sizes = [8, 128], strides = [1, 1]} : vector<8x384xf32> to vector<8x128xf32>
    %183 = vector.extract_strided_slice %173 {offsets = [0, 384], sizes = [8, 128], strides = [1, 1]} : vector<8x512xf32> to vector<8x128xf32>
    %184 = math.tanh %183 : vector<8x128xf32>
    %185 = arith.mulf %181, %165 : vector<8x128xf32>
    %186 = arith.mulf %180, %184 : vector<8x128xf32>
    %187 = arith.addf %185, %186 : vector<8x128xf32>
    %188 = math.tanh %187 : vector<8x128xf32>
    %189 = arith.mulf %182, %188 : vector<8x128xf32>
    %c8_i32 = arith.constant 8 : i32
    %c0_44 = arith.constant 0 : index
    %c0_45 = arith.constant 0 : index
    %190 = vector.load %arg5[%c0_44, %c0_45] : memref<1x128xf32, #tpu.memory_space<vmem>>, vector<1x128xf32>
    %191 = vector.broadcast %190 : vector<1x128xf32> to vector<8x128xf32>
    %192 = arith.mulf %189, %191 : vector<8x128xf32>
    %cst_46 = arith.constant dense<0.000000e+00> : vector<8xf32>
    %193 = vector.multi_reduction <add>, %192, %cst_46 [1] : vector<8x128xf32> to vector<8xf32>
    %194 = vector.shape_cast %193 : vector<8xf32> to vector<8x1xf32>
    %c0_47 = arith.constant 0 : index
    %c0_48 = arith.constant 0 : index
    %195 = vector.load %arg6[%c0_47, %c0_48] : memref<1x1xf32, #tpu.memory_space<vmem>>, vector<1x1xf32>
    %196 = vector.broadcast %195 : vector<1x1xf32> to vector<8x1xf32>
    %197 = arith.addf %194, %196 : vector<8x1xf32>
    %c0_49 = arith.constant 0 : index
    %c0_50 = arith.constant 0 : index
    %198 = vector.load %arg7[%c0_49, %c0_50] : memref<8x1xf32, #tpu.memory_space<vmem>>, vector<8x1xf32>
    tpu.vector_store %arg7[%c0_49, %c0_50], %197 {strides = array<i32>} : memref<8x1xf32, #tpu.memory_space<vmem>>, vector<8x1xf32>,
    return
  }
  func.func @transform_0(%arg0: i32) -> (i32, i32, i32) {
    %c0_i32 = arith.constant 0 : i32
    %c0_i32_0 = arith.constant 0 : i32
    %c0_i32_1 = arith.constant 0 : i32
    return %c0_i32, %arg0, %c0_i32_0 : i32, i32, i32
  }
  func.func @transform_1(%arg0: i32) -> (i32, i32) {
    %c0_i32 = arith.constant 0 : i32
    %c0_i32_0 = arith.constant 0 : i32
    %c0_i32_1 = arith.constant 0 : i32
    return %c0_i32, %c0_i32_0 : i32, i32
  }
  func.func @transform_2(%arg0: i32) -> (i32, i32) {
    %c0_i32 = arith.constant 0 : i32
    %c0_i32_0 = arith.constant 0 : i32
    %c0_i32_1 = arith.constant 0 : i32
    return %c0_i32, %c0_i32_0 : i32, i32
  }
  func.func @transform_3(%arg0: i32) -> (i32, i32) {
    %c0_i32 = arith.constant 0 : i32
    %c0_i32_0 = arith.constant 0 : i32
    %c0_i32_1 = arith.constant 0 : i32
    return %c0_i32, %c0_i32_0 : i32, i32
  }
  func.func @transform_4(%arg0: i32) -> (i32, i32) {
    %c0_i32 = arith.constant 0 : i32
    %c0_i32_0 = arith.constant 0 : i32
    %c0_i32_1 = arith.constant 0 : i32
    return %c0_i32, %c0_i32_0 : i32, i32
  }
  func.func @transform_5(%arg0: i32) -> (i32, i32) {
    %c0_i32 = arith.constant 0 : i32
    %c0_i32_0 = arith.constant 0 : i32
    %c0_i32_1 = arith.constant 0 : i32
    return %c0_i32, %c0_i32_0 : i32, i32
  }
  func.func @transform_6(%arg0: i32) -> (i32, i32) {
    %c0_i32 = arith.constant 0 : i32
    %c0_i32_0 = arith.constant 0 : i32
    return %arg0, %c0_i32 : i32, i32
  }
}

</mosaic_0001>

<bundles_post_ra>
// kernel: tpu_custom_call.1
= control target key start
LH: loop header
LB: loop body
LE: loop exit
PB: predicated region body
PF: predicated region fallthrough
CT: control target
= control target key end

     0   :  { %s2278_s0 = inlined_call_operand.vmem [shape: f32[8,8,1], index: 0, kind: input, shape index: {}]   ;;  %s2279_s1 = inlined_call_operand.vmem [shape: f32[1,512], index: 1, kind: input, shape index: {}]   ;;  %s2280_s2 = inlined_call_operand.hbm [shape: bf16[128,512], index: 2, kind: input, shape index: {}]   ;;  %s2281_s3 = inlined_call_operand.vmem [shape: f32[1,512], index: 3, kind: input, shape index: {}]   ;;  %s2282_s4 = inlined_call_operand.vmem [shape: f32[1,128], index: 4, kind: input, shape index: {}]   ;;  %s2283_s5 = inlined_call_operand.<no memory space> [shape: f32[1,1], index: 5, kind: input, shape index: {}]   ;;  %s2284_s6 = inlined_call_operand.vmem [shape: f32[8,1], index: 6, kind: output, shape index: {}]  }
   0x1   :  { %v11_v0 = vstv %s2283_s5 }
   0x2   :  { %12 = vst [vmem:[#allocation3] sm:$0x1] %v11_v0 }
   0x3   :  { %13 = vsyncpa [#allocation5], 0  ;;  %s22_s25 = sshll.u32 %s2280_s2, 4  ;;  %s1762_s26 = smov [#allocation4]   ;;  %s23_s25 = int_to_ptr.hbm [resolvable:$true] %s22_s25 }
   0x4   :  { %s24_s27 = sshll.u32 %s1762_s26, 4  ;;  %s1763_s28 = smov 256   ;;  %s25_s27 = int_to_ptr.vmem [resolvable:$true] %s24_s27 }
   0x5   :  { %s1764_s29 = smov 16  }
   0x6   :  { %30 = dma.hbm_to_vmem [thread:$0]  %s23_s25, 4096, %s25_s27, [#allocation5], %s1763_s28, %s1763_s28, %s1764_s29  }
   0x7   :  { %1760 = dma.done.wait [#allocation5], 4096  }
   0x8   :  { %1761 = vsyncadd [#allocation5], 4294963200  ;;  %v1765_v1 = vmov 0   ;;  %v1529_v2 = vld [vmem:[#allocation4 + $0xe0] sm:$0xf] }
   0x9   :  { %1603 = vset.pattern.permute.xlu0 %v1765_v1  ;;  %1604 = vset.pattern.permute.xlu1 %v1765_v1  ;;  %v1597_v3 = vld [vmem:[#allocation4 + $0xec] sm:$0xf0]  ;;  %v1595_v4 = vld [vmem:[#allocation4 + $0xe4] sm:$0xf]  ;;  %v1531_v6 = vld [vmem:[#allocation4 + $0xf0] sm:$0xf0] }
   0xa   :  { %1605 = vset.pattern.permute.xlu2 %v1765_v1  ;;  %v1810_v5 = vor.u32 %v1597_v3, %v1529_v2  ;;  %v1537_v7 = vld [vmem:[#allocation4 + $0xe8] sm:$0xf]  ;;  %v1598_v8 = vld [vmem:[#allocation4 + $0xf4] sm:$0xf0]  ;;  %v1812_v9 = vor.u32 %v1595_v4, %v1531_v6  ;;  %v1596_v11 = vld [vmem:[#allocation4 + $0xec] sm:$0xf] }
   0xb   :  { %v1814_v10 = vor.u32 %v1598_v8, %v1537_v7  ;;  %v1539_v12 = vld [vmem:[#allocation4 + $0xf8] sm:$0xf0]  ;;  %v1513_v13 = vld [vmem:[#allocation4 + $0xc0] sm:$0xf]  ;;  %v1593_v15 = vld [vmem:[#allocation4 + $0xcc] sm:$0xf0] }
   0xc   :  { %402 = vmatpush.bf16.msra.mxu0 %v1810_v5  ;;  %v1817_v14 = vor.u32 %v1596_v11, %v1539_v12  ;;  %v1591_v16 = vld [vmem:[#allocation4 + $0xc4] sm:$0xf]  ;;  %v1515_v17 = vld [vmem:[#allocation4 + $0xd0] sm:$0xf0]  ;;  %415 = vmatpush.bf16.msra.mxu1 %v1812_v9  ;;  %v1821_v18 = vor.u32 %v1593_v15, %v1513_v13  ;;  %v1521_v20 = vld [vmem:[#allocation4 + $0xc8] sm:$0xf] }
   0xd   :  { %428 = vmatpush.bf16.msra.mxu2 %v1814_v10  ;;  %v1823_v19 = vor.u32 %v1591_v16, %v1515_v17  ;;  %v1594_v21 = vld [vmem:[#allocation4 + $0xd4] sm:$0xf0]  ;;  %v1592_v22 = vld [vmem:[#allocation4 + $0xcc] sm:$0xf]  ;;  %v1523_v24 = vld [vmem:[#allocation4 + $0xd8] sm:$0xf0] }
   0xe   :  { %441 = vmatpush.bf16.msra.mxu3 %v1817_v14  ;;  %v1826_v23 = vor.u32 %v1594_v21, %v1521_v20  ;;  %v1497_v25 = vld [vmem:[#allocation4 + $0xa0] sm:$0xf]  ;;  %v1589_v26 = vld [vmem:[#allocation4 + $0xac] sm:$0xf0]  ;;  %v1828_v27 = vor.u32 %v1592_v22, %v1523_v24  ;;  %v1587_v28 = vld [vmem:[#allocation4 + $0xa4] sm:$0xf] }
   0xf   :  { %v1499_v29 = vld [vmem:[#allocation4 + $0xb0] sm:$0xf0]  ;;  %v1505_v30 = vld [vmem:[#allocation4 + $0xa8] sm:$0xf]  ;;  %v1831_v31 = vor.u32 %v1589_v26, %v1497_v25  ;;  %v1590_v32 = vld [vmem:[#allocation4 + $0xb4] sm:$0xf0] }
  0x10   :  { %403 = vmatpush.bf16.msra.mxu0 %v1821_v18  ;;  %v1588_v33 = vld [vmem:[#allocation4 + $0xac] sm:$0xf]  ;;  %v1507_v34 = vld [vmem:[#allocation4 + $0xb8] sm:$0xf0]  ;;  %416 = vmatpush.bf16.msra.mxu1 %v1823_v19  ;;  %v1835_v35 = vor.u32 %v1587_v28, %v1499_v29  ;;  %v1837_v36 = vor.u32 %v1590_v32, %v1505_v30  ;;  %v1481_v37 = vld [vmem:[#allocation4 + $0x80] sm:$0xf] }
  0x11   :  { %429 = vmatpush.bf16.msra.mxu2 %v1826_v23  ;;  %v1585_v38 = vld [vmem:[#allocation4 + $0x8c] sm:$0xf0]  ;;  %v1583_v39 = vld [vmem:[#allocation4 + $0x84] sm:$0xf]  ;;  %v1840_v40 = vor.u32 %v1588_v33, %v1507_v34  ;;  %v1483_v41 = vld [vmem:[#allocation4 + $0x90] sm:$0xf0] }
  0x12   :  { %442 = vmatpush.bf16.msra.mxu3 %v1828_v27  ;;  %v1489_v42 = vld [vmem:[#allocation4 + $0x88] sm:$0xf]  ;;  %v1586_v43 = vld [vmem:[#allocation4 + $0x94] sm:$0xf0]  ;;  %v1584_v44 = vld [vmem:[#allocation4 + $0x8c] sm:$0xf]  ;;  %v1843_v46 = vor.u32 %v1585_v38, %v1481_v37  ;;  %v1847_v47 = vor.u32 %v1583_v39, %v1483_v41 }
  0x13   :  { %v1491_v45 = vld [vmem:[#allocation4 + $0x98] sm:$0xf0]  ;;  %v1849_v48 = vor.u32 %v1586_v43, %v1489_v42  ;;  %v1465_v49 = vld [vmem:[#allocation4 + $0x60] sm:$0xf]  ;;  %v1581_v50 = vld [vmem:[#allocation4 + $0x6c] sm:$0xf0] }
  0x14   :  { %404 = vmatpush.bf16.msra.mxu0 %v1831_v31  ;;  %417 = vmatpush.bf16.msra.mxu1 %v1835_v35  ;;  %v1579_v51 = vld [vmem:[#allocation4 + $0x64] sm:$0xf]  ;;  %v1852_v52 = vor.u32 %v1584_v44, %v1491_v45  ;;  %v1467_v53 = vld [vmem:[#allocation4 + $0x70] sm:$0xf0]  ;;  %v1473_v54 = vld [vmem:[#allocation4 + $0x68] sm:$0xf]  ;;  %v1855_v58 = vor.u32 %v1581_v50, %v1465_v49 }
  0x15   :  { %430 = vmatpush.bf16.msra.mxu2 %v1837_v36  ;;  %v1582_v55 = vld [vmem:[#allocation4 + $0x74] sm:$0xf0]  ;;  %v1580_v56 = vld [vmem:[#allocation4 + $0x6c] sm:$0xf]  ;;  %v1475_v57 = vld [vmem:[#allocation4 + $0x78] sm:$0xf0]  ;;  %v1859_v60 = vor.u32 %v1579_v51, %v1467_v53 }
  0x16   :  { %443 = vmatpush.bf16.msra.mxu3 %v1840_v40  ;;  %v1449_v59 = vld [vmem:[#allocation4 + $0x40] sm:$0xf]  ;;  %v1861_v61 = vor.u32 %v1582_v55, %v1473_v54  ;;  %v1577_v62 = vld [vmem:[#allocation4 + $0x4c] sm:$0xf0]  ;;  %v1575_v63 = vld [vmem:[#allocation4 + $0x44] sm:$0xf]  ;;  %v1867_v2 = vor.u32 %v1580_v56, %v1475_v57 }
  0x17   :  { %v42_v0 = vld [vmem:[%s2278_s0] sm:$0xff]  ;;  %v1451_v3 = vld [vmem:[#allocation4 + $0x50] sm:$0xf0]  ;;  %v1457_v4 = vld [vmem:[#allocation4 + $0x48] sm:$0xf]  ;;  %v1870_v11 = vor.u32 %v1577_v62, %v1449_v59 }
  0x18   :  { %405 = vmatpush.bf16.msra.mxu0 %v1843_v46  ;;  %418 = vmatpush.bf16.msra.mxu1 %v1847_v47  ;;  %v1578_v6 = vld [vmem:[#allocation4 + $0x54] sm:$0xf0]  ;;  %v1576_v7 = vld [vmem:[#allocation4 + $0x4c] sm:$0xf]  ;;  %v1459_v8 = vld [vmem:[#allocation4 + $0x58] sm:$0xf0]  ;;  %v1874_v15 = vor.u32 %v1575_v63, %v1451_v3 }
  0x19   :  { %431 = vmatpush.bf16.msra.mxu2 %v1849_v48  ;;  %53 = vperm.xlu0 %1603, %v42_v0   ;;  %v1433_v12 = vld [vmem:[#allocation4 + $0x20] sm:$0xf]  ;;  %v1573_v13 = vld [vmem:[#allocation4 + $0x2c] sm:$0xf0]  ;;  %v1876_v16 = vor.u32 %v1578_v6, %v1457_v4  ;;  %v1571_v17 = vld [vmem:[#allocation4 + $0x24] sm:$0xf]  ;;  %v1879_v22 = vor.u32 %v1576_v7, %v1459_v8 }
  0x1a   :  { %444 = vmatpush.bf16.msra.mxu3 %v1852_v52  ;;  %v1435_v20 = vld [vmem:[#allocation4 + $0x30] sm:$0xf0]  ;;  %v1441_v21 = vld [vmem:[#allocation4 + $0x28] sm:$0xf]  ;;  %v1574_v24 = vld [vmem:[#allocation4 + $0x34] sm:$0xf0]  ;;  %v1885_v29 = vor.u32 %v1573_v13, %v1433_v12 }
  0x1b   :  { %v1572_v25 = vld [vmem:[#allocation4 + $0x2c] sm:$0xf]  ;;  %v1443_v26 = vld [vmem:[#allocation4 + $0x38] sm:$0xf0]  ;;  %v1889_v30 = vor.u32 %v1571_v17, %v1435_v20  ;;  %v1891_v32 = vor.u32 %v1574_v24, %v1441_v21  ;;  %v1417_v33 = vld [vmem:[#allocation4] sm:$0xf] }
  0x1c   :  { %406 = vmatpush.bf16.msra.mxu0 %v1855_v58  ;;  %419 = vmatpush.bf16.msra.mxu1 %v1859_v60  ;;  %v43_v28 = vld [vmem:[%s2278_s0 + $0x8] sm:$0xff]  ;;  %v1569_v34 = vld [vmem:[#allocation4 + $0xc] sm:$0xf0]  ;;  %v1894_v38 = vor.u32 %v1572_v25, %v1443_v26  ;;  %v1419_v39 = vld [vmem:[#allocation4 + $0x10] sm:$0xf0] }
  0x1d   :  { %432 = vmatpush.bf16.msra.mxu2 %v1861_v61  ;;  %v1567_v37 = vld [vmem:[#allocation4 + $0x4] sm:$0xf]  ;;  %v1425_v41 = vld [vmem:[#allocation4 + $0x8] sm:$0xf]  ;;  %v1570_v42 = vld [vmem:[#allocation4 + $0x14] sm:$0xf0]  ;;  %v1897_v45 = vor.u32 %v1569_v34, %v1417_v33 }
  0x1e   :  { %445 = vmatpush.bf16.msra.mxu3 %v1867_v2  ;;  %v1568_v43 = vld [vmem:[#allocation4 + $0xc] sm:$0xf]  ;;  %v1427_v44 = vld [vmem:[#allocation4 + $0x18] sm:$0xf0]  ;;  %v1901_v49 = vor.u32 %v1567_v37, %v1419_v39  ;;  %v1903_v50 = vor.u32 %v1570_v42, %v1425_v41 }
  0x1f   :  { %v1906_v51 = vor.u32 %v1568_v43, %v1427_v44  ;;  %v48_v53 = vld [vmem:[%s2278_s0 + $0x30] sm:$0xff]  ;;  %v132_v56 = vld [vmem:[%s2281_s3] sm:$0xf] }
  0x20   :  { %407 = vmatpush.bf16.msra.mxu0 %v1870_v11  ;;  %420 = vmatpush.bf16.msra.mxu1 %v1874_v15  ;;  %v1994_v62 = vperm.slane %v132_v56, 0  ;;  %v1997_v0 = vperm.slane %v132_v56, 1  ;;  %v2004_v20 = vperm.slane %v132_v56, 2 }
  0x21   :  { %433 = vmatpush.bf16.msra.mxu2 %v1876_v16  ;;  %58 = vperm.xlu0 %1603, %v43_v28  }
  0x22   :  { %446 = vmatpush.bf16.msra.mxu3 %v1879_v22 }
  0x24   :  { %408 = vmatpush.bf16.msra.mxu0 %v1885_v29  ;;  %421 = vmatpush.bf16.msra.mxu1 %v1889_v30 }
  0x25   :  { %434 = vmatpush.bf16.msra.mxu2 %v1891_v32 }
  0x26   :  { %447 = vmatpush.bf16.msra.mxu3 %v1894_v38 }
  0x28   :  { %409 = vmatpush.bf16.msra.mxu0 %v1897_v45  ;;  %422 = vmatpush.bf16.msra.mxu1 %v1901_v49 }
  0x29   :  { %435 = vmatpush.bf16.msra.mxu2 %v1903_v50  ;;  %83 = vperm.xlu0 %1603, %v48_v53  }
  0x2a   :  { %448 = vmatpush.bf16.msra.mxu3 %v1906_v51 }
  0x2b   :  { %410 = vmatmul.bf16.vlgmr.msra.gmra.mxu0 %v1765_v1  ;;  %423 = vmatmul.bf16.vlgmr.msra.gmra.mxu1 %v1765_v1 }
  0x2c   :  { %540 = vmatpush.bf16.msrb.mxu1 %v1812_v9  ;;  %436 = vmatmul.bf16.vlgmr.msra.gmra.mxu2 %v1765_v1 }
  0x2d   :  { %449 = vmatmul.bf16.vlgmr.msra.gmra.mxu3 %v1765_v1  ;;  %527 = vmatpush.bf16.msrb.mxu0 %v1810_v5  ;;  %v50_v1 = vld [vmem:[%s2279_s1] sm:$0xf] }
  0x2e   :  { %553 = vmatpush.bf16.msrb.mxu2 %v1814_v10  ;;  %566 = vmatpush.bf16.msrb.mxu3 %v1817_v14  ;;  %v1986_v54 = vperm.slane %v50_v1, 0  ;;  %v1988_v55 = vperm.slane %v50_v1, 1  ;;  %v2000_v4 = vperm.slane %v50_v1, 2  ;;  %v2007_v39 = vperm.slane %v50_v1, 3 }
  0x30   :  { %541 = vmatpush.bf16.msrb.mxu1 %v1823_v19  ;;  %2289 = vst [vmem:[#allocation7_spill] sm:$0xff] %v2007_v39 }
  0x31   :  { %528 = vmatpush.bf16.msrb.mxu0 %v1821_v18 }
  0x32   :  { %554 = vmatpush.bf16.msrb.mxu2 %v1826_v23  ;;  %567 = vmatpush.bf16.msrb.mxu3 %v1828_v27 }
  0x34   :  { %542 = vmatpush.bf16.msrb.mxu1 %v1835_v35 }
  0x35   :  { %529 = vmatpush.bf16.msrb.mxu0 %v1831_v31 }
  0x36   :  { %555 = vmatpush.bf16.msrb.mxu2 %v1837_v36  ;;  %568 = vmatpush.bf16.msrb.mxu3 %v1840_v40 }
  0x38   :  { %543 = vmatpush.bf16.msrb.mxu1 %v1847_v47 }
  0x39   :  { %530 = vmatpush.bf16.msrb.mxu0 %v1843_v46 }
  0x3a   :  { %556 = vmatpush.bf16.msrb.mxu2 %v1849_v48  ;;  %569 = vmatpush.bf16.msrb.mxu3 %v1852_v52 }
  0x3c   :  { %544 = vmatpush.bf16.msrb.mxu1 %v1859_v60 }
  0x3d   :  { %531 = vmatpush.bf16.msrb.mxu0 %v1855_v58 }
  0x3e   :  { %557 = vmatpush.bf16.msrb.mxu2 %v1861_v61  ;;  %570 = vmatpush.bf16.msrb.mxu3 %v1867_v2 }
  0x40   :  { %545 = vmatpush.bf16.msrb.mxu1 %v1874_v15 }
  0x41   :  { %532 = vmatpush.bf16.msrb.mxu0 %v1870_v11 }
  0x42   :  { %558 = vmatpush.bf16.msrb.mxu2 %v1876_v16  ;;  %571 = vmatpush.bf16.msrb.mxu3 %v1879_v22 }
  0x44   :  { %546 = vmatpush.bf16.msrb.mxu1 %v1889_v30 }
  0x45   :  { %533 = vmatpush.bf16.msrb.mxu0 %v1885_v29 }
  0x46   :  { %559 = vmatpush.bf16.msrb.mxu2 %v1891_v32  ;;  %572 = vmatpush.bf16.msrb.mxu3 %v1894_v38 }
  0x48   :  { %547 = vmatpush.bf16.msrb.mxu1 %v1901_v49 }
  0x49   :  { %534 = vmatpush.bf16.msrb.mxu0 %v1897_v45 }
  0x4a   :  { %560 = vmatpush.bf16.msrb.mxu2 %v1903_v50  ;;  %573 = vmatpush.bf16.msrb.mxu3 %v1906_v51 }
  0x4c   :  { %665 = vmatpush.bf16.msra.mxu1 %v1812_v9 }
  0x4d   :  { %652 = vmatpush.bf16.msra.mxu0 %v1810_v5 }
  0x4e   :  { %678 = vmatpush.bf16.msra.mxu2 %v1814_v10  ;;  %691 = vmatpush.bf16.msra.mxu3 %v1817_v14 }
  0x50   :  { %666 = vmatpush.bf16.msra.mxu1 %v1823_v19 }
  0x51   :  { %653 = vmatpush.bf16.msra.mxu0 %v1821_v18 }
  0x52   :  { %679 = vmatpush.bf16.msra.mxu2 %v1826_v23  ;;  %692 = vmatpush.bf16.msra.mxu3 %v1828_v27 }
  0x54   :  { %667 = vmatpush.bf16.msra.mxu1 %v1835_v35 }
  0x55   :  { %654 = vmatpush.bf16.msra.mxu0 %v1831_v31 }
  0x56   :  { %680 = vmatpush.bf16.msra.mxu2 %v1837_v36  ;;  %693 = vmatpush.bf16.msra.mxu3 %v1840_v40 }
  0x58   :  { %668 = vmatpush.bf16.msra.mxu1 %v1847_v47 }
  0x59   :  { %655 = vmatpush.bf16.msra.mxu0 %v1843_v46 }
  0x5a   :  { %681 = vmatpush.bf16.msra.mxu2 %v1849_v48  ;;  %694 = vmatpush.bf16.msra.mxu3 %v1852_v52 }
  0x5c   :  { %669 = vmatpush.bf16.msra.mxu1 %v1859_v60 }
  0x5d   :  { %656 = vmatpush.bf16.msra.mxu0 %v1855_v58 }
  0x5e   :  { %682 = vmatpush.bf16.msra.mxu2 %v1861_v61  ;;  %695 = vmatpush.bf16.msra.mxu3 %v1867_v2 }
  0x60   :  { %670 = vmatpush.bf16.msra.mxu1 %v1874_v15 }
  0x61   :  { %657 = vmatpush.bf16.msra.mxu0 %v1870_v11 }
  0x62   :  { %683 = vmatpush.bf16.msra.mxu2 %v1876_v16  ;;  %696 = vmatpush.bf16.msra.mxu3 %v1879_v22 }
  0x64   :  { %671 = vmatpush.bf16.msra.mxu1 %v1889_v30 }
  0x65   :  { %658 = vmatpush.bf16.msra.mxu0 %v1885_v29 }
  0x66   :  { %684 = vmatpush.bf16.msra.mxu2 %v1891_v32  ;;  %697 = vmatpush.bf16.msra.mxu3 %v1894_v38 }
  0x68   :  { %672 = vmatpush.bf16.msra.mxu1 %v1901_v49 }
  0x69   :  { %659 = vmatpush.bf16.msra.mxu0 %v1897_v45 }
  0x6a   :  { %685 = vmatpush.bf16.msra.mxu2 %v1903_v50  ;;  %698 = vmatpush.bf16.msra.mxu3 %v1906_v51 }
  0x8b   :  { %v54_v57 = vpop.permute.xlu0 %53 }
  0x8c   :  { %v100_v59 = vmul.f32 %v1986_v54, %v54_v57  ;;  %v101_v63 = vmul.f32 %v1988_v55, %v54_v57  ;;  %v102_v17 = vmul.f32 %v2000_v4, %v54_v57 }
  0x8e   :  { %v142_v3 = vadd.f32 %v1994_v62, %v100_v59  ;;  %v143_v6 = vadd.f32 %v1997_v0, %v101_v63  ;;  %v144_v25 = vadd.f32 %v2004_v20, %v102_v17  ;;  %v103_v59 = vmul.f32 %v2007_v39, %v54_v57 }
  0x8f   :  { %v2010_v63 = vperm.slane %v132_v56, 3 }
  0x91   :  { %2290 = vst [vmem:[#allocation8_spill] sm:$0xff] %v2010_v63 }
  0xa8   :  { %v411_v7 = vpop.f32.mrf.mxu0  ;;  %v424_v12 = vpop.f32.mrf.mxu1 }
  0xa9   :  { %v454_v8 = vadd.f32 %v411_v7, %v142_v3  ;;  %v455_v13 = vadd.f32 %v424_v12, %v143_v6 }
  0xab   :  { %v1543_v21 = vmul.f32 -1.442695, %v454_v8  ;;  %v1544_v24 = vmul.f32 -1.442695, %v455_v13  ;;  %v145_v8 = vadd.f32 %v2010_v63, %v103_v59 }
  0xad   :  { %1608 = vpow2.f32 %v1543_v21 }
  0xae   :  { %1610 = vpow2.f32 %v1544_v24 }
  0xaf   :  { %v437_v26 = vpop.f32.mrf.mxu2 }
  0xb0   :  { %v456_v28 = vadd.f32 %v437_v26, %v144_v25  ;;  %v450_v33 = vpop.f32.mrf.mxu3  ;;  %v413_v34 = vpop.f32.mrf.mxu0 }
  0xb1   :  { %v426_v37 = vpop.f32.mrf.mxu1  ;;  %v457_v13 = vadd.f32 %v450_v33, %v145_v8 }
  0xb2   :  { %v1545_v41 = vmul.f32 -1.442695, %v456_v28 }
  0xb3   :  { %v1609_v42 = vpop.eup %1608 }
  0xb4   :  { %v1611_v43 = vpop.eup %1610  ;;  %v467_v44 = vadd.f32 1.0, %v1609_v42  ;;  %1612 = vpow2.f32 %v1545_v41 }
  0xb5   :  { %v468_v53 = vadd.f32 1.0, %v1611_v43 }
  0xb6   :  { %1614 = vrcp.f32 %v467_v44  ;;  %v481_v28 = vand.u32 2147483648, %v467_v44  ;;  %v479_v34 = vand.u32 2147483647, %v467_v44  ;;  %vm475_vm2 = vweird.f32 %v467_v44 }
  0xb7   :  { %1616 = vrcp.f32 %v468_v53  ;;  %v439_v3 = vpop.f32.mrf.mxu2  ;;  %v496_v57 = vand.u32 2147483648, %v468_v53  ;;  %v494_v41 = vand.u32 2147483647, %v468_v53  ;;  %vm490_vm3 = vweird.f32 %v468_v53 }
  0xb8   :  { %v452_v6 = vpop.f32.mrf.mxu3  ;;  %v482_v59 = vor.u32 1.1754944e-38, %v481_v28  ;;  %vm480_vm5 = vcmp.eq.f32.partialorder %v479_v34, 8.507059e+37 }
  0xb9   :  { %v497_v6 = vor.u32 1.1754944e-38, %v496_v57  ;;  %vm495_vm7 = vcmp.eq.f32.partialorder %v494_v41, 8.507059e+37 }
  0xba   :  { %v1613_v7 = vpop.eup %1612 }
  0xbb   :  { %v469_v12 = vadd.f32 1.0, %v1613_v7 }
  0xbc   :  { %v1615_v1 = vpop.eup %1614 }
  0xbd   :  { %v1617_v17 = vpop.eup %1616  ;;  %v471_v21 = vmul.f32 %v1615_v1, %v467_v44  ;;  %1618 = vrcp.f32 %v469_v12  ;;  %vm476_vm0 = vweird.f32 %v1615_v1  ;;  %vm505_vm9 = vweird.f32 %v469_v12 }
  0xbe   :  { %v486_v24 = vmul.f32 %v1617_v17, %v468_v53  ;;  %1620 = vtanh.f32 %v457_v13  ;;  %vm491_vm1 = vweird.f32 %v1617_v17  ;;  %vm477_vm4 = vmor %vm475_vm2, %vm476_vm0  ;;  %v511_v53 = vand.u32 2147483648, %v469_v12 }
  0xbf   :  { %v472_v25 = vsub.f32 1.0, %v471_v21  ;;  %vm492_vm6 = vmor %vm490_vm3, %vm491_vm1 }
  0xc0   :  { %v487_v26 = vsub.f32 1.0, %v486_v24  ;;  %v512_v57 = vor.u32 1.1754944e-38, %v511_v53 }
  0xc1   :  { %v473_v56 = vmul.f32 %v1615_v1, %v472_v25 }
  0xc2   :  { %v488_v37 = vmul.f32 %v1617_v17, %v487_v26 }
  0xc3   :  { %v1619_v42 = vpop.eup %1618  ;;  %v474_v43 = vadd.f32 %v1615_v1, %v473_v56 }
  0xc4   :  { %v501_v33 = vmul.f32 %v1619_v42, %v469_v12  ;;  %v489_v3 = vadd.f32 %v1617_v17, %v488_v37  ;;  %v1621_v8 = vpop.eup %1620  ;;  %vm506_vm8 = vweird.f32 %v1619_v42 }
  0xc5   :  { %v478_v7 = vsel %vm477_vm4, %v1615_v1, %v474_v43  ;;  %v509_v1 = vand.u32 2147483647, %v469_v12  ;;  %vm507_vm10 = vmor %vm505_vm9, %vm506_vm8 }
  0xc6   :  { %v502_v13 = vsub.f32 1.0, %v501_v33  ;;  %v483_v21 = vsel %vm480_vm5, %v482_v59, %v478_v7  ;;  %v493_v24 = vsel %vm492_vm6, %v1617_v17, %v489_v3 }
  0xc7   :  { %v498_v25 = vsel %vm495_vm7, %v497_v6, %v493_v24  ;;  %v517_v26 = vmul.f32 %v1621_v8, %v483_v21  ;;  %vm510_vm11 = vcmp.eq.f32.partialorder %v509_v1, 8.507059e+37  ;;  %v44_v21 = vld [vmem:[%s2278_s0 + $0x10] sm:$0xff] }
  0xc8   :  { %v516_v63 = vmul.f32 0.0, %v498_v25  ;;  %v503_v39 = vmul.f32 %v1619_v42, %v502_v13  ;;  %63 = vperm.xlu1 %1604, %v44_v21  }
  0xca   :  { %v2013_v56 = vadd.f32 %v517_v26, %v516_v63  ;;  %v504_v44 = vadd.f32 %v1619_v42, %v503_v39  ;;  %v59_v39 = vpop.permute.xlu0 %58 }
  0xcb   :  { %v104_v63 = vmul.f32 %v1986_v54, %v59_v39  ;;  %v105_v12 = vmul.f32 %v1988_v55, %v59_v39  ;;  %v106_v7 = vmul.f32 %v2000_v4, %v59_v39 }
  0xcc   :  { %1622 = vtanh.f32 %v2013_v56  ;;  %v508_v28 = vsel %vm507_vm10, %v1619_v42, %v504_v44 }
  0xcd   :  { %v513_v17 = vsel %vm510_vm11, %v512_v57, %v508_v28  ;;  %v146_v42 = vadd.f32 %v1994_v62, %v104_v63  ;;  %v147_v43 = vadd.f32 %v1997_v0, %v105_v12  ;;  %v148_v24 = vadd.f32 %v2004_v20, %v106_v7  ;;  %v45_v57 = vld [vmem:[%s2278_s0 + $0x18] sm:$0xff]  ;;  %v2291_v63 = vld [vmem:[#allocation7_spill] sm:$0xff] }
  0xce   :  { %v107_v12 = vmul.f32 %v2291_v63, %v59_v39 }
  0xd0   :  { %68 = vperm.xlu1 %1604, %v45_v57  }
  0xd2   :  { %v1623_v34 = vpop.eup %1622 }
  0xd3   :  { %v520_v37 = vmul.f32 %v1623_v34, %v513_v17 }
  0xd5   :  { %v526_v41 = vpack.c.bf16 %v520_v37, %v520_v37 }
  0xd7   :  { %535 = vmatmul.bf16.vlgmr.msrb.gmra.mxu0 %v526_v41  ;;  %548 = vmatmul.bf16.vlgmr.msrb.gmra.mxu1 %v526_v41 }
  0xd8   :  { %561 = vmatmul.bf16.vlgmr.msrb.gmra.mxu2 %v526_v41  ;;  %574 = vmatmul.bf16.vlgmr.msrb.gmra.mxu3 %v526_v41 }
  0xd9   :  { %777 = vmatpush.bf16.msrb.mxu0 %v1810_v5  ;;  %790 = vmatpush.bf16.msrb.mxu1 %v1812_v9 }
  0xda   :  { %803 = vmatpush.bf16.msrb.mxu2 %v1814_v10  ;;  %816 = vmatpush.bf16.msrb.mxu3 %v1817_v14 }
  0xdd   :  { %778 = vmatpush.bf16.msrb.mxu0 %v1821_v18  ;;  %791 = vmatpush.bf16.msrb.mxu1 %v1823_v19 }
  0xde   :  { %804 = vmatpush.bf16.msrb.mxu2 %v1826_v23  ;;  %817 = vmatpush.bf16.msrb.mxu3 %v1828_v27 }
  0xe1   :  { %779 = vmatpush.bf16.msrb.mxu0 %v1831_v31  ;;  %792 = vmatpush.bf16.msrb.mxu1 %v1835_v35 }
  0xe2   :  { %805 = vmatpush.bf16.msrb.mxu2 %v1837_v36  ;;  %818 = vmatpush.bf16.msrb.mxu3 %v1840_v40 }
  0xe5   :  { %780 = vmatpush.bf16.msrb.mxu0 %v1843_v46  ;;  %793 = vmatpush.bf16.msrb.mxu1 %v1847_v47 }
  0xe6   :  { %806 = vmatpush.bf16.msrb.mxu2 %v1849_v48  ;;  %819 = vmatpush.bf16.msrb.mxu3 %v1852_v52 }
  0xe9   :  { %781 = vmatpush.bf16.msrb.mxu0 %v1855_v58  ;;  %794 = vmatpush.bf16.msrb.mxu1 %v1859_v60 }
  0xea   :  { %807 = vmatpush.bf16.msrb.mxu2 %v1861_v61  ;;  %820 = vmatpush.bf16.msrb.mxu3 %v1867_v2 }
  0xed   :  { %782 = vmatpush.bf16.msrb.mxu0 %v1870_v11  ;;  %795 = vmatpush.bf16.msrb.mxu1 %v1874_v15 }
  0xee   :  { %808 = vmatpush.bf16.msrb.mxu2 %v1876_v16  ;;  %821 = vmatpush.bf16.msrb.mxu3 %v1879_v22 }
  0xf1   :  { %783 = vmatpush.bf16.msrb.mxu0 %v1885_v29  ;;  %796 = vmatpush.bf16.msrb.mxu1 %v1889_v30 }
  0xf2   :  { %809 = vmatpush.bf16.msrb.mxu2 %v1891_v32  ;;  %822 = vmatpush.bf16.msrb.mxu3 %v1894_v38 }
  0xf5   :  { %784 = vmatpush.bf16.msrb.mxu0 %v1897_v45  ;;  %797 = vmatpush.bf16.msrb.mxu1 %v1901_v49 }
  0xf6   :  { %810 = vmatpush.bf16.msrb.mxu2 %v1903_v50  ;;  %823 = vmatpush.bf16.msrb.mxu3 %v1906_v51 }
 0x154   :  { %v536_v33 = vpop.f32.mrf.mxu0  ;;  %v549_v59 = vpop.f32.mrf.mxu1 }
 0x155   :  { %v579_v3 = vadd.f32 %v536_v33, %v146_v42  ;;  %v580_v6 = vadd.f32 %v549_v59, %v147_v43  ;;  %v2292_v59 = vld [vmem:[#allocation8_spill] sm:$0xff] }
 0x157   :  { %v1546_v8 = vmul.f32 -1.442695, %v579_v3  ;;  %v1547_v13 = vmul.f32 -1.442695, %v580_v6  ;;  %v149_v3 = vadd.f32 %v2292_v59, %v107_v12  ;;  %v49_v6 = vld [vmem:[%s2278_s0 + $0x38] sm:$0xff] }
 0x158   :  { %88 = vperm.xlu1 %1604, %v49_v6  }
 0x159   :  { %1624 = vpow2.f32 %v1546_v8 }
 0x15a   :  { %1626 = vpow2.f32 %v1547_v13 }
 0x15b   :  { %v562_v25 = vpop.f32.mrf.mxu2  ;;  %v575_v26 = vpop.f32.mrf.mxu3 }
 0x15c   :  { %v581_v44 = vadd.f32 %v562_v25, %v148_v24  ;;  %v538_v53 = vpop.f32.mrf.mxu0  ;;  %v551_v1 = vpop.f32.mrf.mxu1  ;;  %v582_v13 = vadd.f32 %v575_v26, %v149_v3 }
 0x15e   :  { %v1548_v28 = vmul.f32 -1.442695, %v581_v44 }
 0x15f   :  { %v1625_v34 = vpop.eup %1624 }
 0x160   :  { %v1627_v17 = vpop.eup %1626  ;;  %v592_v37 = vadd.f32 1.0, %v1625_v34  ;;  %1628 = vpow2.f32 %v1548_v28 }
 0x161   :  { %v593_v41 = vadd.f32 1.0, %v1627_v17 }
 0x162   :  { %1630 = vrcp.f32 %v592_v37  ;;  %v606_v53 = vand.u32 2147483648, %v592_v37  ;;  %v604_v57 = vand.u32 2147483647, %v592_v37  ;;  %vm600_vm14 = vweird.f32 %v592_v37 }
 0x163   :  { %1632 = vrcp.f32 %v593_v41  ;;  %v564_v42 = vpop.f32.mrf.mxu2  ;;  %v577_v43 = vpop.f32.mrf.mxu3  ;;  %v621_v1 = vand.u32 2147483648, %v593_v41  ;;  %v619_v17 = vand.u32 2147483647, %v593_v41  ;;  %vm615_vm15 = vweird.f32 %v593_v41 }
 0x164   :  { %v607_v43 = vor.u32 1.1754944e-38, %v606_v53  ;;  %vm605_vm2 = vcmp.eq.f32.partialorder %v604_v57, 8.507059e+37 }
 0x165   :  { %v622_v3 = vor.u32 1.1754944e-38, %v621_v1  ;;  %vm620_vm3 = vcmp.eq.f32.partialorder %v619_v17, 8.507059e+37 }
 0x166   :  { %v1629_v33 = vpop.eup %1628 }
 0x167   :  { %v594_v7 = vadd.f32 1.0, %v1629_v33 }
 0x168   :  { %v1631_v8 = vpop.eup %1630 }
 0x169   :  { %v1633_v21 = vpop.eup %1632  ;;  %v596_v24 = vmul.f32 %v1631_v8, %v592_v37  ;;  %1634 = vrcp.f32 %v594_v7  ;;  %vm601_vm12 = vweird.f32 %v1631_v8  ;;  %v636_v53 = vand.u32 2147483648, %v594_v7 }
 0x16a   :  { %v611_v25 = vmul.f32 %v1633_v21, %v593_v41  ;;  %1636 = vtanh.f32 %v582_v13  ;;  %vm616_vm13 = vweird.f32 %v1633_v21  ;;  %vm602_vm0 = vmor %vm600_vm14, %vm601_vm12  ;;  %vm630_vm5 = vweird.f32 %v594_v7 }
 0x16b   :  { %v597_v44 = vsub.f32 1.0, %v596_v24  ;;  %vm617_vm1 = vmor %vm615_vm15, %vm616_vm13  ;;  %v637_v57 = vor.u32 1.1754944e-38, %v636_v53 }
 0x16c   :  { %v612_v39 = vsub.f32 1.0, %v611_v25 }
 0x16d   :  { %v598_v28 = vmul.f32 %v1631_v8, %v597_v44 }
 0x16e   :  { %v613_v34 = vmul.f32 %v1633_v21, %v612_v39 }
 0x16f   :  { %v1635_v12 = vpop.eup %1634  ;;  %v599_v42 = vadd.f32 %v1631_v8, %v598_v28 }
 0x170   :  { %v626_v26 = vmul.f32 %v1635_v12, %v594_v7  ;;  %v614_v33 = vadd.f32 %v1633_v21, %v613_v34  ;;  %v1637_v13 = vpop.eup %1636  ;;  %vm631_vm4 = vweird.f32 %v1635_v12 }
 0x171   :  { %v603_v6 = vsel %vm602_vm0, %v1631_v8, %v599_v42  ;;  %v634_v8 = vand.u32 2147483647, %v594_v7  ;;  %vm632_vm6 = vmor %vm630_vm5, %vm631_vm4 }
 0x172   :  { %v627_v24 = vsub.f32 1.0, %v626_v26  ;;  %v608_v25 = vsel %vm605_vm2, %v607_v43, %v603_v6  ;;  %v618_v44 = vsel %vm617_vm1, %v1633_v21, %v614_v33 }
 0x173   :  { %v623_v39 = vsel %vm620_vm3, %v622_v3, %v618_v44  ;;  %v642_v59 = vmul.f32 %v1637_v13, %v608_v25  ;;  %vm635_vm7 = vcmp.eq.f32.partialorder %v634_v8, 8.507059e+37 }
 0x174   :  { %v641_v63 = vmul.f32 %v623_v39, %v2013_v56  ;;  %v628_v28 = vmul.f32 %v1635_v12, %v627_v24  ;;  %v64_v56 = vpop.permute.xlu1 %63 }
 0x175   :  { %v110_v6 = vmul.f32 %v2000_v4, %v64_v56 }
 0x176   :  { %v2066_v37 = vadd.f32 %v642_v59, %v641_v63  ;;  %v629_v41 = vadd.f32 %v1635_v12, %v628_v28  ;;  %v108_v63 = vmul.f32 %v1986_v54, %v64_v56  ;;  %v109_v59 = vmul.f32 %v1988_v55, %v64_v56 }
 0x177   :  { %v152_v25 = vadd.f32 %v2004_v20, %v110_v6 }
 0x178   :  { %1638 = vtanh.f32 %v2066_v37  ;;  %v633_v1 = vsel %vm632_vm6, %v1635_v12, %v629_v41  ;;  %v150_v7 = vadd.f32 %v1994_v62, %v108_v63  ;;  %v151_v12 = vadd.f32 %v1997_v0, %v109_v59 }
 0x179   :  { %v638_v34 = vsel %vm635_vm7, %v637_v57, %v633_v1 }
 0x17e   :  { %v1639_v21 = vpop.eup %1638 }
 0x17f   :  { %v645_v17 = vmul.f32 %v1639_v21, %v638_v34 }
 0x181   :  { %v651_v42 = vpack.c.bf16 %v645_v17, %v645_v17  ;;  %v2293_v17 = vld [vmem:[#allocation7_spill] sm:$0xff] }
 0x183   :  { %660 = vmatmul.bf16.vlgmr.msra.gmra.mxu0 %v651_v42  ;;  %673 = vmatmul.bf16.vlgmr.msra.gmra.mxu1 %v651_v42 }
 0x184   :  { %686 = vmatmul.bf16.vlgmr.msra.gmra.mxu2 %v651_v42  ;;  %699 = vmatmul.bf16.vlgmr.msra.gmra.mxu3 %v651_v42  ;;  %v111_v42 = vmul.f32 %v2293_v17, %v64_v56 }
 0x185   :  { %902 = vmatpush.bf16.msra.mxu0 %v1810_v5  ;;  %915 = vmatpush.bf16.msra.mxu1 %v1812_v9 }
 0x186   :  { %928 = vmatpush.bf16.msra.mxu2 %v1814_v10  ;;  %941 = vmatpush.bf16.msra.mxu3 %v1817_v14 }
 0x189   :  { %903 = vmatpush.bf16.msra.mxu0 %v1821_v18  ;;  %916 = vmatpush.bf16.msra.mxu1 %v1823_v19 }
 0x18a   :  { %929 = vmatpush.bf16.msra.mxu2 %v1826_v23  ;;  %942 = vmatpush.bf16.msra.mxu3 %v1828_v27 }
 0x18d   :  { %904 = vmatpush.bf16.msra.mxu0 %v1831_v31  ;;  %917 = vmatpush.bf16.msra.mxu1 %v1835_v35 }
 0x18e   :  { %930 = vmatpush.bf16.msra.mxu2 %v1837_v36  ;;  %943 = vmatpush.bf16.msra.mxu3 %v1840_v40 }
 0x191   :  { %905 = vmatpush.bf16.msra.mxu0 %v1843_v46  ;;  %918 = vmatpush.bf16.msra.mxu1 %v1847_v47 }
 0x192   :  { %931 = vmatpush.bf16.msra.mxu2 %v1849_v48  ;;  %944 = vmatpush.bf16.msra.mxu3 %v1852_v52 }
 0x195   :  { %906 = vmatpush.bf16.msra.mxu0 %v1855_v58  ;;  %919 = vmatpush.bf16.msra.mxu1 %v1859_v60 }
 0x196   :  { %932 = vmatpush.bf16.msra.mxu2 %v1861_v61  ;;  %945 = vmatpush.bf16.msra.mxu3 %v1867_v2 }
 0x199   :  { %907 = vmatpush.bf16.msra.mxu0 %v1870_v11  ;;  %920 = vmatpush.bf16.msra.mxu1 %v1874_v15 }
 0x19a   :  { %933 = vmatpush.bf16.msra.mxu2 %v1876_v16  ;;  %946 = vmatpush.bf16.msra.mxu3 %v1879_v22 }
 0x19d   :  { %908 = vmatpush.bf16.msra.mxu0 %v1885_v29  ;;  %921 = vmatpush.bf16.msra.mxu1 %v1889_v30 }
 0x19e   :  { %934 = vmatpush.bf16.msra.mxu2 %v1891_v32  ;;  %947 = vmatpush.bf16.msra.mxu3 %v1894_v38 }
 0x1a1   :  { %909 = vmatpush.bf16.msra.mxu0 %v1897_v45  ;;  %922 = vmatpush.bf16.msra.mxu1 %v1901_v49 }
 0x1a2   :  { %935 = vmatpush.bf16.msra.mxu2 %v1903_v50  ;;  %948 = vmatpush.bf16.msra.mxu3 %v1906_v51 }
 0x200   :  { %v661_v26 = vpop.f32.mrf.mxu0  ;;  %v674_v43 = vpop.f32.mrf.mxu1 }
 0x201   :  { %v704_v33 = vadd.f32 %v661_v26, %v150_v7  ;;  %v705_v3 = vadd.f32 %v674_v43, %v151_v12  ;;  %v2294_v12 = vld [vmem:[#allocation8_spill] sm:$0xff] }
 0x202   :  { %v153_v26 = vadd.f32 %v2294_v12, %v111_v42 }
 0x203   :  { %v1549_v13 = vmul.f32 -1.442695, %v704_v33  ;;  %v1550_v24 = vmul.f32 -1.442695, %v705_v3 }
 0x205   :  { %1640 = vpow2.f32 %v1549_v13 }
 0x206   :  { %1642 = vpow2.f32 %v1550_v24 }
 0x207   :  { %v687_v44 = vpop.f32.mrf.mxu2  ;;  %v700_v39 = vpop.f32.mrf.mxu3 }
 0x208   :  { %v706_v28 = vadd.f32 %v687_v44, %v152_v25  ;;  %v663_v41 = vpop.f32.mrf.mxu0  ;;  %v676_v53 = vpop.f32.mrf.mxu1  ;;  %v707_v3 = vadd.f32 %v700_v39, %v153_v26 }
 0x20a   :  { %v1551_v8 = vmul.f32 -1.442695, %v706_v28 }
 0x20b   :  { %v1641_v1 = vpop.eup %1640 }
 0x20c   :  { %v1643_v57 = vpop.eup %1642  ;;  %v717_v21 = vadd.f32 1.0, %v1641_v1  ;;  %1644 = vpow2.f32 %v1551_v8 }
 0x20d   :  { %v718_v34 = vadd.f32 1.0, %v1643_v57 }
 0x20e   :  { %1646 = vrcp.f32 %v717_v21  ;;  %v731_v28 = vand.u32 2147483648, %v717_v21  ;;  %v729_v56 = vand.u32 2147483647, %v717_v21  ;;  %vm725_vm10 = vweird.f32 %v717_v21 }
 0x20f   :  { %1648 = vrcp.f32 %v718_v34  ;;  %v689_v63 = vpop.f32.mrf.mxu2  ;;  %v702_v59 = vpop.f32.mrf.mxu3  ;;  %v746_v41 = vand.u32 2147483648, %v718_v34  ;;  %v744_v1 = vand.u32 2147483647, %v718_v34  ;;  %vm740_vm11 = vweird.f32 %v718_v34 }
 0x210   :  { %v732_v63 = vor.u32 1.1754944e-38, %v731_v28  ;;  %vm730_vm14 = vcmp.eq.f32.partialorder %v729_v56, 8.507059e+37 }
 0x211   :  { %vm745_vm15 = vcmp.eq.f32.partialorder %v744_v1, 8.507059e+37 }
 0x212   :  { %v1645_v7 = vpop.eup %1644 }
 0x213   :  { %v719_v43 = vadd.f32 1.0, %v1645_v7  ;;  %v747_v7 = vor.u32 1.1754944e-38, %v746_v41 }
 0x214   :  { %v1647_v33 = vpop.eup %1646 }
 0x215   :  { %v1649_v6 = vpop.eup %1648  ;;  %v721_v13 = vmul.f32 %v1647_v33, %v717_v21  ;;  %1650 = vrcp.f32 %v719_v43  ;;  %vm726_vm8 = vweird.f32 %v1647_v33  ;;  %v761_v28 = vand.u32 2147483648, %v719_v43 }
 0x216   :  { %v736_v24 = vmul.f32 %v1649_v6, %v718_v34  ;;  %1652 = vtanh.f32 %v707_v3  ;;  %vm741_vm9 = vweird.f32 %v1649_v6  ;;  %vm727_vm12 = vmor %vm725_vm10, %vm726_vm8  ;;  %vm755_vm1 = vweird.f32 %v719_v43 }
 0x217   :  { %v722_v25 = vsub.f32 1.0, %v721_v13  ;;  %vm742_vm13 = vmor %vm740_vm11, %vm741_vm9  ;;  %v762_v56 = vor.u32 1.1754944e-38, %v761_v28 }
 0x218   :  { %v737_v44 = vsub.f32 1.0, %v736_v24 }
 0x219   :  { %v723_v53 = vmul.f32 %v1647_v33, %v722_v25 }
 0x21a   :  { %v738_v8 = vmul.f32 %v1649_v6, %v737_v44 }
 0x21b   :  { %v1651_v57 = vpop.eup %1650  ;;  %v724_v42 = vadd.f32 %v1647_v33, %v723_v53 }
 0x21c   :  { %v751_v39 = vmul.f32 %v1651_v57, %v719_v43  ;;  %v739_v59 = vadd.f32 %v1649_v6, %v738_v8  ;;  %v1653_v3 = vpop.eup %1652  ;;  %vm756_vm0 = vweird.f32 %v1651_v57 }
 0x21d   :  { %v728_v26 = vsel %vm727_vm12, %v1647_v33, %v724_v42  ;;  %v759_v33 = vand.u32 2147483647, %v719_v43  ;;  %vm757_vm2 = vmor %vm755_vm1, %vm756_vm0 }
 0x21e   :  { %v752_v13 = vsub.f32 1.0, %v751_v39  ;;  %v733_v24 = vsel %vm730_vm14, %v732_v63, %v728_v26  ;;  %v743_v25 = vsel %vm742_vm13, %v1649_v6, %v739_v59 }
 0x21f   :  { %v748_v44 = vsel %vm745_vm15, %v747_v7, %v743_v25  ;;  %v767_v12 = vmul.f32 %v1653_v3, %v733_v24  ;;  %vm760_vm3 = vcmp.eq.f32.partialorder %v759_v33, 8.507059e+37 }
 0x220   :  { %v766_v17 = vmul.f32 %v748_v44, %v2066_v37  ;;  %v753_v53 = vmul.f32 %v1651_v57, %v752_v13  ;;  %v69_v37 = vpop.permute.xlu1 %68 }
 0x221   :  { %v114_v26 = vmul.f32 %v2000_v4, %v69_v37 }
 0x222   :  { %v2110_v21 = vadd.f32 %v767_v12, %v766_v17  ;;  %v754_v34 = vadd.f32 %v1651_v57, %v753_v53  ;;  %v112_v17 = vmul.f32 %v1986_v54, %v69_v37  ;;  %v113_v12 = vmul.f32 %v1988_v55, %v69_v37 }
 0x223   :  { %v156_v24 = vadd.f32 %v2004_v20, %v114_v26 }
 0x224   :  { %1654 = vtanh.f32 %v2110_v21  ;;  %v758_v41 = vsel %vm757_vm2, %v1651_v57, %v754_v34  ;;  %v154_v43 = vadd.f32 %v1994_v62, %v112_v17  ;;  %v155_v57 = vadd.f32 %v1997_v0, %v113_v12 }
 0x225   :  { %v763_v8 = vsel %vm760_vm3, %v762_v56, %v758_v41 }
 0x22a   :  { %v1655_v6 = vpop.eup %1654 }
 0x22b   :  { %v770_v1 = vmul.f32 %v1655_v6, %v763_v8 }
 0x22d   :  { %v776_v42 = vpack.c.bf16 %v770_v1, %v770_v1  ;;  %v2295_v1 = vld [vmem:[#allocation7_spill] sm:$0xff] }
 0x22f   :  { %785 = vmatmul.bf16.vlgmr.msrb.gmra.mxu0 %v776_v42  ;;  %798 = vmatmul.bf16.vlgmr.msrb.gmra.mxu1 %v776_v42 }
 0x230   :  { %811 = vmatmul.bf16.vlgmr.msrb.gmra.mxu2 %v776_v42  ;;  %824 = vmatmul.bf16.vlgmr.msrb.gmra.mxu3 %v776_v42  ;;  %v115_v42 = vmul.f32 %v2295_v1, %v69_v37  ;;  %v47_v37 = vld [vmem:[%s2278_s0 + $0x28] sm:$0xff] }
 0x231   :  { %1027 = vmatpush.bf16.msrb.mxu0 %v1810_v5  ;;  %1040 = vmatpush.bf16.msrb.mxu1 %v1812_v9 }
 0x232   :  { %1053 = vmatpush.bf16.msrb.mxu2 %v1814_v10  ;;  %1066 = vmatpush.bf16.msrb.mxu3 %v1817_v14 }
 0x235   :  { %1028 = vmatpush.bf16.msrb.mxu0 %v1821_v18  ;;  %1041 = vmatpush.bf16.msrb.mxu1 %v1823_v19 }
 0x236   :  { %1054 = vmatpush.bf16.msrb.mxu2 %v1826_v23  ;;  %1067 = vmatpush.bf16.msrb.mxu3 %v1828_v27 }
 0x239   :  { %1029 = vmatpush.bf16.msrb.mxu0 %v1831_v31  ;;  %1042 = vmatpush.bf16.msrb.mxu1 %v1835_v35 }
 0x23a   :  { %1055 = vmatpush.bf16.msrb.mxu2 %v1837_v36  ;;  %1068 = vmatpush.bf16.msrb.mxu3 %v1840_v40 }
 0x23d   :  { %1030 = vmatpush.bf16.msrb.mxu0 %v1843_v46  ;;  %1043 = vmatpush.bf16.msrb.mxu1 %v1847_v47 }
 0x23e   :  { %1056 = vmatpush.bf16.msrb.mxu2 %v1849_v48  ;;  %1069 = vmatpush.bf16.msrb.mxu3 %v1852_v52 }
 0x241   :  { %1031 = vmatpush.bf16.msrb.mxu0 %v1855_v58  ;;  %1044 = vmatpush.bf16.msrb.mxu1 %v1859_v60 }
 0x242   :  { %1057 = vmatpush.bf16.msrb.mxu2 %v1861_v61  ;;  %1070 = vmatpush.bf16.msrb.mxu3 %v1867_v2 }
 0x245   :  { %1032 = vmatpush.bf16.msrb.mxu0 %v1870_v11  ;;  %1045 = vmatpush.bf16.msrb.mxu1 %v1874_v15 }
 0x246   :  { %1058 = vmatpush.bf16.msrb.mxu2 %v1876_v16  ;;  %1071 = vmatpush.bf16.msrb.mxu3 %v1879_v22 }
 0x249   :  { %1033 = vmatpush.bf16.msrb.mxu0 %v1885_v29  ;;  %1046 = vmatpush.bf16.msrb.mxu1 %v1889_v30 }
 0x24a   :  { %1059 = vmatpush.bf16.msrb.mxu2 %v1891_v32  ;;  %1072 = vmatpush.bf16.msrb.mxu3 %v1894_v38 }
 0x24d   :  { %1034 = vmatpush.bf16.msrb.mxu0 %v1897_v45  ;;  %1047 = vmatpush.bf16.msrb.mxu1 %v1901_v49 }
 0x24e   :  { %1060 = vmatpush.bf16.msrb.mxu2 %v1903_v50  ;;  %1073 = vmatpush.bf16.msrb.mxu3 %v1906_v51 }
 0x2ac   :  { %v786_v39 = vpop.f32.mrf.mxu0  ;;  %v799_v63 = vpop.f32.mrf.mxu1 }
 0x2ad   :  { %v829_v59 = vadd.f32 %v786_v39, %v154_v43  ;;  %v830_v7 = vadd.f32 %v799_v63, %v155_v57  ;;  %v46_v43 = vld [vmem:[%s2278_s0 + $0x20] sm:$0xff]  ;;  %v2296_v39 = vld [vmem:[#allocation8_spill] sm:$0xff] }
 0x2ae   :  { %73 = vperm.xlu2 %1605, %v46_v43   ;;  %v157_v63 = vadd.f32 %v2296_v39, %v115_v42 }
 0x2af   :  { %v1552_v3 = vmul.f32 -1.442695, %v829_v59  ;;  %v1553_v13 = vmul.f32 -1.442695, %v830_v7 }
 0x2b1   :  { %1656 = vpow2.f32 %v1552_v3 }
 0x2b2   :  { %1658 = vpow2.f32 %v1553_v13 }
 0x2b3   :  { %v812_v25 = vpop.f32.mrf.mxu2  ;;  %v825_v44 = vpop.f32.mrf.mxu3 }
 0x2b4   :  { %v831_v53 = vadd.f32 %v812_v25, %v156_v24  ;;  %v788_v34 = vpop.f32.mrf.mxu0  ;;  %v801_v28 = vpop.f32.mrf.mxu1  ;;  %v832_v26 = vadd.f32 %v825_v44, %v157_v63 }
 0x2b6   :  { %v1554_v33 = vmul.f32 -1.442695, %v831_v53  ;;  %78 = vperm.xlu2 %1605, %v47_v37  }
 0x2b7   :  { %v1657_v41 = vpop.eup %1656 }
 0x2b8   :  { %v1659_v56 = vpop.eup %1658  ;;  %v842_v6 = vadd.f32 1.0, %v1657_v41  ;;  %1660 = vpow2.f32 %v1554_v33 }
 0x2b9   :  { %v843_v8 = vadd.f32 1.0, %v1659_v56 }
 0x2ba   :  { %1662 = vrcp.f32 %v842_v6  ;;  %v856_v34 = vand.u32 2147483648, %v842_v6  ;;  %v854_v41 = vand.u32 2147483647, %v842_v6  ;;  %vm850_vm6 = vweird.f32 %v842_v6 }
 0x2bb   :  { %1664 = vrcp.f32 %v843_v8  ;;  %v814_v17 = vpop.f32.mrf.mxu2  ;;  %v827_v12 = vpop.f32.mrf.mxu3  ;;  %v871_v28 = vand.u32 2147483648, %v843_v8  ;;  %v869_v44 = vand.u32 2147483647, %v843_v8  ;;  %vm865_vm7 = vweird.f32 %v843_v8 }
 0x2bc   :  { %v857_v43 = vor.u32 1.1754944e-38, %v856_v34  ;;  %vm855_vm10 = vcmp.eq.f32.partialorder %v854_v41, 8.507059e+37 }
 0x2bd   :  { %v872_v63 = vor.u32 1.1754944e-38, %v871_v28  ;;  %vm870_vm11 = vcmp.eq.f32.partialorder %v869_v44, 8.507059e+37 }
 0x2be   :  { %v1661_v57 = vpop.eup %1660 }
 0x2bf   :  { %v844_v59 = vadd.f32 1.0, %v1661_v57 }
 0x2c0   :  { %v1663_v7 = vpop.eup %1662 }
 0x2c1   :  { %v1665_v3 = vpop.eup %1664  ;;  %v846_v13 = vmul.f32 %v1663_v7, %v842_v6  ;;  %1666 = vrcp.f32 %v844_v59  ;;  %vm851_vm4 = vweird.f32 %v1663_v7  ;;  %v886_v34 = vand.u32 2147483648, %v844_v59 }
 0x2c2   :  { %v861_v24 = vmul.f32 %v1665_v3, %v843_v8  ;;  %1668 = vtanh.f32 %v832_v26  ;;  %vm866_vm5 = vweird.f32 %v1665_v3  ;;  %vm852_vm8 = vmor %vm850_vm6, %vm851_vm4  ;;  %vm880_vm13 = vweird.f32 %v844_v59 }
 0x2c3   :  { %v847_v25 = vsub.f32 1.0, %v846_v13  ;;  %vm867_vm9 = vmor %vm865_vm7, %vm866_vm5  ;;  %v887_v41 = vor.u32 1.1754944e-38, %v886_v34 }
 0x2c4   :  { %v862_v53 = vsub.f32 1.0, %v861_v24 }
 0x2c5   :  { %v848_v33 = vmul.f32 %v1663_v7, %v847_v25 }
 0x2c6   :  { %v863_v56 = vmul.f32 %v1665_v3, %v862_v53 }
 0x2c7   :  { %v1667_v42 = vpop.eup %1666  ;;  %v849_v17 = vadd.f32 %v1663_v7, %v848_v33 }
 0x2c8   :  { %v876_v12 = vmul.f32 %v1667_v42, %v844_v59  ;;  %v864_v57 = vadd.f32 %v1665_v3, %v863_v56  ;;  %v1669_v26 = vpop.eup %1668  ;;  %vm881_vm12 = vweird.f32 %v1667_v42 }
 0x2c9   :  { %v853_v13 = vsel %vm852_vm8, %v1663_v7, %v849_v17  ;;  %v884_v7 = vand.u32 2147483647, %v844_v59  ;;  %vm882_vm14 = vmor %vm880_vm13, %vm881_vm12 }
 0x2ca   :  { %v877_v24 = vsub.f32 1.0, %v876_v12  ;;  %v858_v25 = vsel %vm855_vm10, %v857_v43, %v853_v13  ;;  %v868_v39 = vsel %vm867_vm9, %v1665_v3, %v864_v57 }
 0x2cb   :  { %v873_v37 = vsel %vm870_vm11, %v872_v63, %v868_v39  ;;  %v892_v53 = vmul.f32 %v1669_v26, %v858_v25  ;;  %vm885_vm15 = vcmp.eq.f32.partialorder %v884_v7, 8.507059e+37 }
 0x2cc   :  { %v891_v1 = vmul.f32 %v873_v37, %v2110_v21  ;;  %v878_v33 = vmul.f32 %v1667_v42, %v877_v24 }
 0x2ce   :  { %v2160_v6 = vadd.f32 %v892_v53, %v891_v1  ;;  %v879_v8 = vadd.f32 %v1667_v42, %v878_v33 }
 0x2d0   :  { %1670 = vtanh.f32 %v2160_v6  ;;  %v883_v28 = vsel %vm882_vm14, %v1667_v42, %v879_v8 }
 0x2d1   :  { %v888_v56 = vsel %vm885_vm15, %v887_v41, %v883_v28 }
 0x2d6   :  { %v1671_v3 = vpop.eup %1670 }
 0x2d7   :  { %v895_v39 = vmul.f32 %v1671_v3, %v888_v56 }
 0x2d9   :  { %v901_v44 = vpack.c.bf16 %v895_v39, %v895_v39  ;;  %v2297_v39 = vld [vmem:[#allocation7_spill] sm:$0xff] }
 0x2db   :  { %910 = vmatmul.bf16.vlgmr.msra.gmra.mxu0 %v901_v44  ;;  %923 = vmatmul.bf16.vlgmr.msra.gmra.mxu1 %v901_v44 }
 0x2dc   :  { %936 = vmatmul.bf16.vlgmr.msra.gmra.mxu2 %v901_v44  ;;  %949 = vmatmul.bf16.vlgmr.msra.gmra.mxu3 %v901_v44 }
 0x2dd   :  { %1152 = vmatpush.bf16.msra.mxu0 %v1810_v5  ;;  %1165 = vmatpush.bf16.msra.mxu1 %v1812_v9 }
 0x2de   :  { %1178 = vmatpush.bf16.msra.mxu2 %v1814_v10  ;;  %1191 = vmatpush.bf16.msra.mxu3 %v1817_v14 }
 0x2e1   :  { %1153 = vmatpush.bf16.msra.mxu0 %v1821_v18  ;;  %1166 = vmatpush.bf16.msra.mxu1 %v1823_v19 }
 0x2e2   :  { %1179 = vmatpush.bf16.msra.mxu2 %v1826_v23  ;;  %1192 = vmatpush.bf16.msra.mxu3 %v1828_v27 }
 0x2e5   :  { %1154 = vmatpush.bf16.msra.mxu0 %v1831_v31  ;;  %1167 = vmatpush.bf16.msra.mxu1 %v1835_v35 }
 0x2e6   :  { %1180 = vmatpush.bf16.msra.mxu2 %v1837_v36  ;;  %1193 = vmatpush.bf16.msra.mxu3 %v1840_v40 }
 0x2e9   :  { %1155 = vmatpush.bf16.msra.mxu0 %v1843_v46  ;;  %1168 = vmatpush.bf16.msra.mxu1 %v1847_v47 }
 0x2ea   :  { %1181 = vmatpush.bf16.msra.mxu2 %v1849_v48  ;;  %1194 = vmatpush.bf16.msra.mxu3 %v1852_v52 }
 0x2ed   :  { %1156 = vmatpush.bf16.msra.mxu0 %v1855_v58  ;;  %1169 = vmatpush.bf16.msra.mxu1 %v1859_v60 }
 0x2ee   :  { %1182 = vmatpush.bf16.msra.mxu2 %v1861_v61  ;;  %1195 = vmatpush.bf16.msra.mxu3 %v1867_v2 }
 0x2f1   :  { %1157 = vmatpush.bf16.msra.mxu0 %v1870_v11  ;;  %1170 = vmatpush.bf16.msra.mxu1 %v1874_v15 }
 0x2f2   :  { %1183 = vmatpush.bf16.msra.mxu2 %v1876_v16  ;;  %1196 = vmatpush.bf16.msra.mxu3 %v1879_v22 }
 0x2f5   :  { %1158 = vmatpush.bf16.msra.mxu0 %v1885_v29  ;;  %1171 = vmatpush.bf16.msra.mxu1 %v1889_v30 }
 0x2f6   :  { %1184 = vmatpush.bf16.msra.mxu2 %v1891_v32  ;;  %1197 = vmatpush.bf16.msra.mxu3 %v1894_v38 }
 0x2f9   :  { %1159 = vmatpush.bf16.msra.mxu0 %v1897_v45  ;;  %1172 = vmatpush.bf16.msra.mxu1 %v1901_v49 }
 0x2fa   :  { %1185 = vmatpush.bf16.msra.mxu2 %v1903_v50  ;;  %1198 = vmatpush.bf16.msra.mxu3 %v1906_v51 }
 0x308   :  { %v74_v21 = vpop.permute.xlu2 %73 }
 0x309   :  { %v116_v1 = vmul.f32 %v1986_v54, %v74_v21  ;;  %v117_v59 = vmul.f32 %v1988_v55, %v74_v21  ;;  %v118_v13 = vmul.f32 %v2000_v4, %v74_v21  ;;  %v119_v44 = vmul.f32 %v2297_v39, %v74_v21 }
 0x30b   :  { %v158_v42 = vadd.f32 %v1994_v62, %v116_v1  ;;  %v159_v17 = vadd.f32 %v1997_v0, %v117_v59  ;;  %v160_v25 = vadd.f32 %v2004_v20, %v118_v13 }
 0x358   :  { %v911_v12 = vpop.f32.mrf.mxu0  ;;  %v924_v43 = vpop.f32.mrf.mxu1 }
 0x359   :  { %v954_v57 = vadd.f32 %v911_v12, %v158_v42  ;;  %v955_v63 = vadd.f32 %v924_v43, %v159_v17  ;;  %v2298_v17 = vld [vmem:[#allocation8_spill] sm:$0xff] }
 0x35a   :  { %v161_v12 = vadd.f32 %v2298_v17, %v119_v44 }
 0x35b   :  { %v1555_v26 = vmul.f32 -1.442695, %v954_v57  ;;  %v1556_v24 = vmul.f32 -1.442695, %v955_v63 }
 0x35d   :  { %1672 = vpow2.f32 %v1555_v26 }
 0x35e   :  { %1674 = vpow2.f32 %v1556_v24 }
 0x35f   :  { %v937_v37 = vpop.f32.mrf.mxu2  ;;  %v950_v53 = vpop.f32.mrf.mxu3 }
 0x360   :  { %v956_v33 = vadd.f32 %v937_v37, %v160_v25  ;;  %v913_v8 = vpop.f32.mrf.mxu0  ;;  %v926_v34 = vpop.f32.mrf.mxu1  ;;  %v957_v63 = vadd.f32 %v950_v53, %v161_v12 }
 0x362   :  { %v1557_v7 = vmul.f32 -1.442695, %v956_v33 }
 0x363   :  { %v1673_v28 = vpop.eup %1672 }
 0x364   :  { %v1675_v41 = vpop.eup %1674  ;;  %v967_v3 = vadd.f32 1.0, %v1673_v28  ;;  %1676 = vpow2.f32 %v1557_v7 }
 0x365   :  { %v968_v56 = vadd.f32 1.0, %v1675_v41 }
 0x366   :  { %1678 = vrcp.f32 %v967_v3  ;;  %v981_v33 = vand.u32 2147483648, %v967_v3  ;;  %v979_v21 = vand.u32 2147483647, %v967_v3  ;;  %vm975_vm2 = vweird.f32 %v967_v3 }
 0x367   :  { %1680 = vrcp.f32 %v968_v56  ;;  %v939_v1 = vpop.f32.mrf.mxu2  ;;  %v952_v59 = vpop.f32.mrf.mxu3  ;;  %v996_v8 = vand.u32 2147483648, %v968_v56  ;;  %v994_v28 = vand.u32 2147483647, %v968_v56  ;;  %vm990_vm3 = vweird.f32 %v968_v56 }
 0x368   :  { %v982_v1 = vor.u32 1.1754944e-38, %v981_v33  ;;  %vm980_vm6 = vcmp.eq.f32.partialorder %v979_v21, 8.507059e+37 }
 0x369   :  { %vm995_vm7 = vcmp.eq.f32.partialorder %v994_v28, 8.507059e+37 }
 0x36a   :  { %v1677_v42 = vpop.eup %1676 }
 0x36b   :  { %v969_v43 = vadd.f32 1.0, %v1677_v42  ;;  %v997_v42 = vor.u32 1.1754944e-38, %v996_v8 }
 0x36c   :  { %v1679_v57 = vpop.eup %1678 }
 0x36d   :  { %v1681_v13 = vpop.eup %1680  ;;  %v971_v26 = vmul.f32 %v1679_v57, %v967_v3  ;;  %1682 = vrcp.f32 %v969_v43  ;;  %vm976_vm0 = vweird.f32 %v1679_v57  ;;  %v1011_v33 = vand.u32 2147483648, %v969_v43 }
 0x36e   :  { %v986_v24 = vmul.f32 %v1681_v13, %v968_v56  ;;  %1684 = vtanh.f32 %v957_v63  ;;  %vm991_vm1 = vweird.f32 %v1681_v13  ;;  %vm977_vm4 = vmor %vm975_vm2, %vm976_vm0  ;;  %vm1005_vm9 = vweird.f32 %v969_v43 }
 0x36f   :  { %v972_v25 = vsub.f32 1.0, %v971_v26  ;;  %vm992_vm5 = vmor %vm990_vm3, %vm991_vm1  ;;  %v1012_v21 = vor.u32 1.1754944e-38, %v1011_v33 }
 0x370   :  { %v987_v37 = vsub.f32 1.0, %v986_v24 }
 0x371   :  { %v973_v34 = vmul.f32 %v1679_v57, %v972_v25 }
 0x372   :  { %v988_v7 = vmul.f32 %v1681_v13, %v987_v37 }
 0x373   :  { %v1683_v41 = vpop.eup %1682  ;;  %v974_v44 = vadd.f32 %v1679_v57, %v973_v34 }
 0x374   :  { %v1001_v53 = vmul.f32 %v1683_v41, %v969_v43  ;;  %v989_v59 = vadd.f32 %v1681_v13, %v988_v7  ;;  %v1685_v63 = vpop.eup %1684  ;;  %vm1006_vm8 = vweird.f32 %v1683_v41 }
 0x375   :  { %v978_v12 = vsel %vm977_vm4, %v1679_v57, %v974_v44  ;;  %v1009_v57 = vand.u32 2147483647, %v969_v43  ;;  %vm1007_vm10 = vmor %vm1005_vm9, %vm1006_vm8 }
 0x376   :  { %v1002_v26 = vsub.f32 1.0, %v1001_v53  ;;  %v983_v24 = vsel %vm980_vm6, %v982_v1, %v978_v12  ;;  %v993_v25 = vsel %vm992_vm5, %v1681_v13, %v989_v59 }
 0x377   :  { %v998_v37 = vsel %vm995_vm7, %v997_v42, %v993_v25  ;;  %v1017_v17 = vmul.f32 %v1685_v63, %v983_v24  ;;  %vm1010_vm11 = vcmp.eq.f32.partialorder %v1009_v57, 8.507059e+37 }
 0x378   :  { %v1016_v39 = vmul.f32 %v998_v37, %v2160_v6  ;;  %v1003_v34 = vmul.f32 %v1683_v41, %v1002_v26 }
 0x37a   :  { %v2204_v3 = vadd.f32 %v1017_v17, %v1016_v39  ;;  %v1004_v56 = vadd.f32 %v1683_v41, %v1003_v34 }
 0x37c   :  { %1686 = vtanh.f32 %v2204_v3  ;;  %v1008_v8 = vsel %vm1007_vm10, %v1683_v41, %v1004_v56 }
 0x37d   :  { %v1013_v7 = vsel %vm1010_vm11, %v1012_v21, %v1008_v8 }
 0x382   :  { %v1687_v13 = vpop.eup %1686 }
 0x383   :  { %v1020_v28 = vmul.f32 %v1687_v13, %v1013_v7 }
 0x385   :  { %v1026_v44 = vpack.c.bf16 %v1020_v28, %v1020_v28 }
 0x387   :  { %1035 = vmatmul.bf16.vlgmr.msrb.gmra.mxu0 %v1026_v44  ;;  %1048 = vmatmul.bf16.vlgmr.msrb.gmra.mxu1 %v1026_v44 }
 0x388   :  { %1061 = vmatmul.bf16.vlgmr.msrb.gmra.mxu2 %v1026_v44  ;;  %1074 = vmatmul.bf16.vlgmr.msrb.gmra.mxu3 %v1026_v44 }
 0x389   :  { %1277 = vmatpush.bf16.msrb.mxu0 %v1810_v5  ;;  %1290 = vmatpush.bf16.msrb.mxu1 %v1812_v9  ;;  %v79_v5 = vpop.permute.xlu2 %78 }
 0x38a   :  { %1303 = vmatpush.bf16.msrb.mxu2 %v1814_v10  ;;  %1316 = vmatpush.bf16.msrb.mxu3 %v1817_v14  ;;  %v120_v9 = vmul.f32 %v1986_v54, %v79_v5  ;;  %v121_v10 = vmul.f32 %v1988_v55, %v79_v5 }
 0x38c   :  { %v162_v14 = vadd.f32 %v1994_v62, %v120_v9 }
 0x38d   :  { %1278 = vmatpush.bf16.msrb.mxu0 %v1821_v18  ;;  %1291 = vmatpush.bf16.msrb.mxu1 %v1823_v19  ;;  %v163_v18 = vadd.f32 %v1997_v0, %v121_v10 }
 0x38e   :  { %1304 = vmatpush.bf16.msrb.mxu2 %v1826_v23  ;;  %1317 = vmatpush.bf16.msrb.mxu3 %v1828_v27 }
 0x391   :  { %1279 = vmatpush.bf16.msrb.mxu0 %v1831_v31  ;;  %1292 = vmatpush.bf16.msrb.mxu1 %v1835_v35  ;;  %v122_v35 = vmul.f32 %v2000_v4, %v79_v5 }
 0x392   :  { %1305 = vmatpush.bf16.msrb.mxu2 %v1837_v36  ;;  %1318 = vmatpush.bf16.msrb.mxu3 %v1840_v40 }
 0x395   :  { %1280 = vmatpush.bf16.msrb.mxu0 %v1843_v46  ;;  %1293 = vmatpush.bf16.msrb.mxu1 %v1847_v47  ;;  %v164_v46 = vadd.f32 %v2004_v20, %v122_v35 }
 0x396   :  { %1306 = vmatpush.bf16.msrb.mxu2 %v1849_v48  ;;  %1319 = vmatpush.bf16.msrb.mxu3 %v1852_v52 }
 0x399   :  { %1281 = vmatpush.bf16.msrb.mxu0 %v1855_v58  ;;  %1294 = vmatpush.bf16.msrb.mxu1 %v1859_v60 }
 0x39a   :  { %1307 = vmatpush.bf16.msrb.mxu2 %v1861_v61  ;;  %1320 = vmatpush.bf16.msrb.mxu3 %v1867_v2 }
 0x39d   :  { %1282 = vmatpush.bf16.msrb.mxu0 %v1870_v11  ;;  %1295 = vmatpush.bf16.msrb.mxu1 %v1874_v15 }
 0x39e   :  { %1308 = vmatpush.bf16.msrb.mxu2 %v1876_v16  ;;  %1321 = vmatpush.bf16.msrb.mxu3 %v1879_v22  ;;  %v2299_v22 = vld [vmem:[#allocation7_spill] sm:$0xff] }
 0x3a1   :  { %1283 = vmatpush.bf16.msrb.mxu0 %v1885_v29  ;;  %1296 = vmatpush.bf16.msrb.mxu1 %v1889_v30  ;;  %v123_v29 = vmul.f32 %v2299_v22, %v79_v5 }
 0x3a2   :  { %1309 = vmatpush.bf16.msrb.mxu2 %v1891_v32  ;;  %1322 = vmatpush.bf16.msrb.mxu3 %v1894_v38 }
 0x3a5   :  { %1284 = vmatpush.bf16.msrb.mxu0 %v1897_v45  ;;  %1297 = vmatpush.bf16.msrb.mxu1 %v1901_v49  ;;  %v2300_v45 = vld [vmem:[#allocation8_spill] sm:$0xff] }
 0x3a6   :  { %1310 = vmatpush.bf16.msrb.mxu2 %v1903_v50  ;;  %1323 = vmatpush.bf16.msrb.mxu3 %v1906_v51  ;;  %v165_v49 = vadd.f32 %v2300_v45, %v123_v29 }
 0x404   :  { %v1036_v19 = vpop.f32.mrf.mxu0  ;;  %v1049_v23 = vpop.f32.mrf.mxu1 }
 0x405   :  { %v1079_v27 = vadd.f32 %v1036_v19, %v162_v14  ;;  %v1080_v31 = vadd.f32 %v1049_v23, %v163_v18 }
 0x407   :  { %v1558_v36 = vmul.f32 -1.442695, %v1079_v27  ;;  %v1559_v40 = vmul.f32 -1.442695, %v1080_v31 }
 0x409   :  { %1688 = vpow2.f32 %v1558_v36 }
 0x40a   :  { %1690 = vpow2.f32 %v1559_v40 }
 0x40b   :  { %v1062_v47 = vpop.f32.mrf.mxu2  ;;  %v1075_v48 = vpop.f32.mrf.mxu3 }
 0x40c   :  { %v1081_v52 = vadd.f32 %v1062_v47, %v164_v46  ;;  %v1038_v58 = vpop.f32.mrf.mxu0  ;;  %v1051_v60 = vpop.f32.mrf.mxu1  ;;  %v1082_v6 = vadd.f32 %v1075_v48, %v165_v49 }
 0x40e   :  { %v1560_v61 = vmul.f32 -1.442695, %v1081_v52 }
 0x40f   :  { %v1689_v2 = vpop.eup %1688 }
 0x410   :  { %v1691_v11 = vpop.eup %1690  ;;  %v1092_v15 = vadd.f32 1.0, %v1689_v2  ;;  %1692 = vpow2.f32 %v1560_v61 }
 0x411   :  { %v1093_v16 = vadd.f32 1.0, %v1691_v11 }
 0x412   :  { %1694 = vrcp.f32 %v1092_v15  ;;  %v1106_v1 = vand.u32 2147483648, %v1092_v15  ;;  %v1104_v12 = vand.u32 2147483647, %v1092_v15  ;;  %vm1100_vm14 = vweird.f32 %v1092_v15 }
 0x413   :  { %1696 = vrcp.f32 %v1093_v16  ;;  %v1064_v30 = vpop.f32.mrf.mxu2  ;;  %v1077_v32 = vpop.f32.mrf.mxu3  ;;  %v1121_v59 = vand.u32 2147483648, %v1093_v16  ;;  %v1119_v26 = vand.u32 2147483647, %v1093_v16  ;;  %vm1115_vm15 = vweird.f32 %v1093_v16 }
 0x414   :  { %v1107_v34 = vor.u32 1.1754944e-38, %v1106_v1  ;;  %vm1105_vm2 = vcmp.eq.f32.partialorder %v1104_v12, 8.507059e+37 }
 0x415   :  { %v1122_v33 = vor.u32 1.1754944e-38, %v1121_v59  ;;  %vm1120_vm3 = vcmp.eq.f32.partialorder %v1119_v26, 8.507059e+37 }
 0x416   :  { %v1693_v38 = vpop.eup %1692 }
 0x417   :  { %v1094_v50 = vadd.f32 1.0, %v1693_v38 }
 0x418   :  { %v1695_v51 = vpop.eup %1694 }
 0x419   :  { %v1697_v39 = vpop.eup %1696  ;;  %v1096_v17 = vmul.f32 %v1695_v51, %v1092_v15  ;;  %1698 = vrcp.f32 %v1094_v50  ;;  %vm1101_vm12 = vweird.f32 %v1695_v51  ;;  %v1136_v18 = vand.u32 2147483648, %v1094_v50 }
 0x41a   :  { %v1111_v43 = vmul.f32 %v1697_v39, %v1093_v16  ;;  %1700 = vtanh.f32 %v1082_v6  ;;  %vm1116_vm13 = vweird.f32 %v1697_v39  ;;  %vm1102_vm0 = vmor %vm1100_vm14, %vm1101_vm12  ;;  %vm1130_vm5 = vweird.f32 %v1094_v50 }
 0x41b   :  { %v1097_v41 = vsub.f32 1.0, %v1096_v17  ;;  %vm1117_vm1 = vmor %vm1115_vm15, %vm1116_vm13  ;;  %v1134_v19 = vand.u32 2147483647, %v1094_v50  ;;  %v1137_v27 = vor.u32 1.1754944e-38, %v1136_v18 }
 0x41c   :  { %v1112_v53 = vsub.f32 1.0, %v1111_v43 }
 0x41d   :  { %v1098_v42 = vmul.f32 %v1695_v51, %v1097_v41  ;;  %vm1135_vm7 = vcmp.eq.f32.partialorder %v1134_v19, 8.507059e+37 }
 0x41e   :  { %v1113_v63 = vmul.f32 %v1697_v39, %v1112_v53 }
 0x41f   :  { %v1699_v24 = vpop.eup %1698  ;;  %v1099_v25 = vadd.f32 %v1695_v51, %v1098_v42 }
 0x420   :  { %v1126_v37 = vmul.f32 %v1699_v24, %v1094_v50  ;;  %v1114_v56 = vadd.f32 %v1697_v39, %v1113_v63  ;;  %v1701_v8 = vpop.eup %1700  ;;  %vm1131_vm4 = vweird.f32 %v1699_v24 }
 0x421   :  { %v1103_v57 = vsel %vm1102_vm0, %v1695_v51, %v1099_v25  ;;  %vm1132_vm6 = vmor %vm1130_vm5, %vm1131_vm4 }
 0x422   :  { %v1127_v21 = vsub.f32 1.0, %v1126_v37  ;;  %v1108_v13 = vsel %vm1105_vm2, %v1107_v34, %v1103_v57  ;;  %v1118_v7 = vsel %vm1117_vm1, %v1697_v39, %v1114_v56 }
 0x423   :  { %v1123_v28 = vsel %vm1120_vm3, %v1122_v33, %v1118_v7  ;;  %v1142_v44 = vmul.f32 %v1701_v8, %v1108_v13 }
 0x424   :  { %v1141_v5 = vmul.f32 %v1123_v28, %v2204_v3  ;;  %v1128_v9 = vmul.f32 %v1699_v24, %v1127_v21  ;;  %v84_v3 = vpop.permute.xlu0 %83 }
 0x425   :  { %v124_v46 = vmul.f32 %v1986_v54, %v84_v3  ;;  %v125_v47 = vmul.f32 %v1988_v55, %v84_v3  ;;  %v126_v11 = vmul.f32 %v2000_v4, %v84_v3  ;;  %v127_v41 = vmul.f32 %v2299_v22, %v84_v3 }
 0x426   :  { %v2248_v10 = vadd.f32 %v1142_v44, %v1141_v5  ;;  %v1129_v14 = vadd.f32 %v1699_v24, %v1128_v9 }
 0x427   :  { %v166_v48 = vadd.f32 %v1994_v62, %v124_v46  ;;  %v167_v52 = vadd.f32 %v1997_v0, %v125_v47  ;;  %v168_v29 = vadd.f32 %v2004_v20, %v126_v11  ;;  %v169_v42 = vadd.f32 %v2300_v45, %v127_v41 }
 0x428   :  { %1702 = vtanh.f32 %v2248_v10  ;;  %v1133_v23 = vsel %vm1132_vm6, %v1699_v24, %v1129_v14 }
 0x429   :  { %v1138_v35 = vsel %vm1135_vm7, %v1137_v27, %v1133_v23 }
 0x42e   :  { %v1703_v31 = vpop.eup %1702 }
 0x42f   :  { %v1145_v36 = vmul.f32 %v1703_v31, %v1138_v35 }
 0x431   :  { %v1151_v40 = vpack.c.bf16 %v1145_v36, %v1145_v36 }
 0x433   :  { %1160 = vmatmul.bf16.vlgmr.msra.gmra.mxu0 %v1151_v40  ;;  %1173 = vmatmul.bf16.vlgmr.msra.gmra.mxu1 %v1151_v40 }
 0x434   :  { %1186 = vmatmul.bf16.vlgmr.msra.gmra.mxu2 %v1151_v40  ;;  %1199 = vmatmul.bf16.vlgmr.msra.gmra.mxu3 %v1151_v40 }
 0x4b0   :  { %v1161_v58 = vpop.f32.mrf.mxu0  ;;  %v1174_v60 = vpop.f32.mrf.mxu1 }
 0x4b1   :  { %v1204_v61 = vadd.f32 %v1161_v58, %v166_v48  ;;  %v1205_v2 = vadd.f32 %v1174_v60, %v167_v52 }
 0x4b3   :  { %v1561_v15 = vmul.f32 -1.442695, %v1204_v61  ;;  %v1562_v16 = vmul.f32 -1.442695, %v1205_v2 }
 0x4b5   :  { %1704 = vpow2.f32 %v1561_v15 }
 0x4b6   :  { %1706 = vpow2.f32 %v1562_v16 }
 0x4b7   :  { %v1187_v30 = vpop.f32.mrf.mxu2  ;;  %v1200_v32 = vpop.f32.mrf.mxu3 }
 0x4b8   :  { %v1206_v38 = vadd.f32 %v1187_v30, %v168_v29  ;;  %v1163_v49 = vpop.f32.mrf.mxu0  ;;  %v1176_v50 = vpop.f32.mrf.mxu1  ;;  %v1207_v26 = vadd.f32 %v1200_v32, %v169_v42 }
 0x4ba   :  { %v1563_v51 = vmul.f32 -1.442695, %v1206_v38 }
 0x4bb   :  { %v1705_v6 = vpop.eup %1704 }
 0x4bc   :  { %v1707_v39 = vpop.eup %1706  ;;  %v1217_v17 = vadd.f32 1.0, %v1705_v6  ;;  %1708 = vpow2.f32 %v1563_v51 }
 0x4bd   :  { %v1218_v43 = vadd.f32 1.0, %v1707_v39 }
 0x4be   :  { %1710 = vrcp.f32 %v1217_v17  ;;  %v1231_v33 = vand.u32 2147483648, %v1217_v17  ;;  %v1229_v21 = vand.u32 2147483647, %v1217_v17  ;;  %vm1225_vm10 = vweird.f32 %v1217_v17 }
 0x4bf   :  { %1712 = vrcp.f32 %v1218_v43  ;;  %v1189_v53 = vpop.f32.mrf.mxu2  ;;  %v1202_v1 = vpop.f32.mrf.mxu3  ;;  %v1246_v57 = vand.u32 2147483648, %v1218_v43  ;;  %v1244_v7 = vand.u32 2147483647, %v1218_v43  ;;  %vm1240_vm11 = vweird.f32 %v1218_v43 }
 0x4c0   :  { %v1232_v9 = vor.u32 1.1754944e-38, %v1231_v33  ;;  %vm1230_vm14 = vcmp.eq.f32.partialorder %v1229_v21, 8.507059e+37 }
 0x4c1   :  { %v1247_v18 = vor.u32 1.1754944e-38, %v1246_v57  ;;  %vm1245_vm15 = vcmp.eq.f32.partialorder %v1244_v7, 8.507059e+37 }
 0x4c2   :  { %v1709_v59 = vpop.eup %1708 }
 0x4c3   :  { %v1219_v12 = vadd.f32 1.0, %v1709_v59 }
 0x4c4   :  { %v1711_v63 = vpop.eup %1710 }
 0x4c5   :  { %v1713_v24 = vpop.eup %1712  ;;  %v1221_v25 = vmul.f32 %v1711_v63, %v1217_v17  ;;  %1714 = vrcp.f32 %v1219_v12  ;;  %vm1226_vm8 = vweird.f32 %v1711_v63  ;;  %v1261_v52 = vand.u32 2147483648, %v1219_v12 }
 0x4c6   :  { %v1236_v37 = vmul.f32 %v1713_v24, %v1218_v43  ;;  %1716 = vtanh.f32 %v1207_v26  ;;  %vm1241_vm9 = vweird.f32 %v1713_v24  ;;  %vm1227_vm12 = vmor %vm1225_vm10, %vm1226_vm8  ;;  %vm1255_vm1 = vweird.f32 %v1219_v12 }
 0x4c7   :  { %v1222_v34 = vsub.f32 1.0, %v1221_v25  ;;  %vm1242_vm13 = vmor %vm1240_vm11, %vm1241_vm9  ;;  %v1259_v58 = vand.u32 2147483647, %v1219_v12  ;;  %v1262_v61 = vor.u32 1.1754944e-38, %v1261_v52 }
 0x4c8   :  { %v1237_v56 = vsub.f32 1.0, %v1236_v37 }
 0x4c9   :  { %v1223_v8 = vmul.f32 %v1711_v63, %v1222_v34  ;;  %vm1260_vm3 = vcmp.eq.f32.partialorder %v1259_v58, 8.507059e+37 }
 0x4ca   :  { %v1238_v13 = vmul.f32 %v1713_v24, %v1237_v56 }
 0x4cb   :  { %v1715_v28 = vpop.eup %1714  ;;  %v1224_v44 = vadd.f32 %v1711_v63, %v1223_v8 }
 0x4cc   :  { %v1251_v5 = vmul.f32 %v1715_v28, %v1219_v12  ;;  %v1239_v14 = vadd.f32 %v1713_v24, %v1238_v13  ;;  %v1717_v23 = vpop.eup %1716  ;;  %vm1256_vm0 = vweird.f32 %v1715_v28 }
 0x4cd   :  { %v1228_v19 = vsel %vm1227_vm12, %v1711_v63, %v1224_v44  ;;  %vm1257_vm2 = vmor %vm1255_vm1, %vm1256_vm0  ;;  %vm1408_vm0 = vcmask 7168  }
 0x4ce   :  { %v1252_v27 = vsub.f32 1.0, %v1251_v5  ;;  %v1233_v31 = vsel %vm1230_vm14, %v1232_v9, %v1228_v19  ;;  %v1243_v35 = vsel %vm1242_vm13, %v1713_v24, %v1239_v14 }
 0x4cf   :  { %v1248_v36 = vsel %vm1245_vm15, %v1247_v18, %v1243_v35  ;;  %v1267_v40 = vmul.f32 %v1717_v23, %v1233_v31 }
 0x4d0   :  { %v1266_v3 = vmul.f32 %v1248_v36, %v2248_v10  ;;  %v1253_v46 = vmul.f32 %v1715_v28, %v1252_v27  ;;  %v89_v10 = vpop.permute.xlu1 %88 }
 0x4d1   :  { %v128_v29 = vmul.f32 %v1986_v54, %v89_v10  ;;  %v129_v30 = vmul.f32 %v1988_v55, %v89_v10  ;;  %v130_v39 = vmul.f32 %v2000_v4, %v89_v10  ;;  %v131_v26 = vmul.f32 %v2299_v22, %v89_v10  ;;  %v1606_v10 = vld [vmem:[%s2282_s4] ss:$0 sm:$0xff] }
 0x4d2   :  { %v2260_v47 = vadd.f32 %v1267_v40, %v1266_v3  ;;  %v1254_v48 = vadd.f32 %v1715_v28, %v1253_v46 }
 0x4d3   :  { %v170_v32 = vadd.f32 %v1994_v62, %v128_v29  ;;  %v171_v38 = vadd.f32 %v1997_v0, %v129_v30  ;;  %v172_v41 = vadd.f32 %v2004_v20, %v130_v39  ;;  %v173_v20 = vadd.f32 %v2300_v45, %v131_v26 }
 0x4d4   :  { %1718 = vtanh.f32 %v2260_v47  ;;  %v1258_v60 = vsel %vm1257_vm2, %v1715_v28, %v1254_v48 }
 0x4d5   :  { %v1263_v11 = vsel %vm1260_vm3, %v1262_v61, %v1258_v60 }
 0x4da   :  { %v1719_v2 = vpop.eup %1718 }
 0x4db   :  { %v1270_v15 = vmul.f32 %v1719_v2, %v1263_v11 }
 0x4dd   :  { %v1276_v16 = vpack.c.bf16 %v1270_v15, %v1270_v15 }
 0x4df   :  { %1285 = vmatmul.bf16.vlgmr.msrb.gmra.mxu0 %v1276_v16  ;;  %1298 = vmatmul.bf16.vlgmr.msrb.gmra.mxu1 %v1276_v16 }
 0x4e0   :  { %1311 = vmatmul.bf16.vlgmr.msrb.gmra.mxu2 %v1276_v16  ;;  %1324 = vmatmul.bf16.vlgmr.msrb.gmra.mxu3 %v1276_v16 }
 0x55c   :  { %v1286_v49 = vpop.f32.mrf.mxu0  ;;  %v1299_v50 = vpop.f32.mrf.mxu1 }
 0x55d   :  { %v1329_v51 = vadd.f32 %v1286_v49, %v170_v32  ;;  %v1330_v6 = vadd.f32 %v1299_v50, %v171_v38  ;;  %v1607_v38 = vld [vmem:[#allocation3] ss:$0 sm:$0xff] }
 0x55f   :  { %v1564_v17 = vmul.f32 -1.442695, %v1329_v51  ;;  %v1565_v43 = vmul.f32 -1.442695, %v1330_v6 }
 0x561   :  { %1720 = vpow2.f32 %v1564_v17 }
 0x562   :  { %1722 = vpow2.f32 %v1565_v43 }
 0x563   :  { %v1312_v53 = vpop.f32.mrf.mxu2  ;;  %v1325_v54 = vpop.f32.mrf.mxu3 }
 0x564   :  { %v1331_v1 = vadd.f32 %v1312_v53, %v172_v41  ;;  %v1288_v55 = vpop.f32.mrf.mxu0  ;;  %v1301_v59 = vpop.f32.mrf.mxu1  ;;  %v1332_v56 = vadd.f32 %v1325_v54, %v173_v20 }
 0x566   :  { %v1566_v62 = vmul.f32 -1.442695, %v1331_v1 }
 0x567   :  { %v1721_v42 = vpop.eup %1720 }
 0x568   :  { %v1723_v0 = vpop.eup %1722  ;;  %v1342_v12 = vadd.f32 1.0, %v1721_v42  ;;  %1724 = vpow2.f32 %v1566_v62 }
 0x569   :  { %v1343_v63 = vadd.f32 1.0, %v1723_v0 }
 0x56a   :  { %1726 = vrcp.f32 %v1342_v12  ;;  %v1356_v7 = vand.u32 2147483648, %v1342_v12  ;;  %v1354_v44 = vand.u32 2147483647, %v1342_v12  ;;  %vm1350_vm6 = vweird.f32 %v1342_v12 }
 0x56b   :  { %1728 = vrcp.f32 %v1343_v63  ;;  %v1314_v4 = vpop.f32.mrf.mxu2  ;;  %v1327_v24 = vpop.f32.mrf.mxu3  ;;  %v1371_v28 = vand.u32 2147483648, %v1343_v63  ;;  %v1369_v9 = vand.u32 2147483647, %v1343_v63  ;;  %vm1365_vm7 = vweird.f32 %v1343_v63 }
 0x56c   :  { %v1357_v18 = vor.u32 1.1754944e-38, %v1356_v7  ;;  %vm1355_vm10 = vcmp.eq.f32.partialorder %v1354_v44, 8.507059e+37 }
 0x56d   :  { %v1372_v27 = vor.u32 1.1754944e-38, %v1371_v28  ;;  %vm1370_vm11 = vcmp.eq.f32.partialorder %v1369_v9, 8.507059e+37 }
 0x56e   :  { %v1725_v25 = vpop.eup %1724 }
 0x56f   :  { %v1344_v37 = vadd.f32 1.0, %v1725_v25 }
 0x570   :  { %v1727_v34 = vpop.eup %1726 }
 0x571   :  { %v1729_v33 = vpop.eup %1728  ;;  %v1346_v57 = vmul.f32 %v1727_v34, %v1342_v12  ;;  %1730 = vrcp.f32 %v1344_v37  ;;  %vm1351_vm4 = vweird.f32 %v1727_v34  ;;  %v1386_v2 = vand.u32 2147483648, %v1344_v37 }
 0x572   :  { %v1361_v8 = vmul.f32 %v1729_v33, %v1343_v63  ;;  %1732 = vtanh.f32 %v1332_v56  ;;  %vm1366_vm5 = vweird.f32 %v1729_v33  ;;  %vm1352_vm8 = vmor %vm1350_vm6, %vm1351_vm4  ;;  %vm1380_vm13 = vweird.f32 %v1344_v37 }
 0x573   :  { %v1347_v21 = vsub.f32 1.0, %v1346_v57  ;;  %vm1367_vm9 = vmor %vm1365_vm7, %vm1366_vm5  ;;  %v1384_v11 = vand.u32 2147483647, %v1344_v37  ;;  %v1387_v16 = vor.u32 1.1754944e-38, %v1386_v2 }
 0x574   :  { %v1362_v13 = vsub.f32 1.0, %v1361_v8 }
 0x575   :  { %v1348_v22 = vmul.f32 %v1727_v34, %v1347_v21  ;;  %vm1385_vm15 = vcmp.eq.f32.partialorder %v1384_v11, 8.507059e+37 }
 0x576   :  { %v1363_v5 = vmul.f32 %v1729_v33, %v1362_v13 }
 0x577   :  { %v1731_v14 = vpop.eup %1730  ;;  %v1349_v45 = vadd.f32 %v1727_v34, %v1348_v22 }
 0x578   :  { %v1364_v19 = vadd.f32 %v1729_v33, %v1363_v5  ;;  %v1376_v23 = vmul.f32 %v1731_v14, %v1344_v37  ;;  %v1733_v35 = vpop.eup %1732  ;;  %vm1381_vm12 = vweird.f32 %v1731_v14 }
 0x579   :  { %v1353_v31 = vsel %vm1352_vm8, %v1727_v34, %v1349_v45  ;;  %vm1382_vm14 = vmor %vm1380_vm13, %vm1381_vm12 }
 0x57a   :  { %v1358_v36 = vsel %vm1355_vm10, %v1357_v18, %v1353_v31  ;;  %v1368_v40 = vsel %vm1367_vm9, %v1729_v33, %v1364_v19  ;;  %v1377_v3 = vsub.f32 1.0, %v1376_v23 }
 0x57b   :  { %v1373_v46 = vsel %vm1370_vm11, %v1372_v27, %v1368_v40  ;;  %v1392_v48 = vmul.f32 %v1733_v35, %v1358_v36 }
 0x57c   :  { %v1391_v52 = vmul.f32 %v1373_v46, %v2260_v47  ;;  %v1378_v58 = vmul.f32 %v1731_v14, %v1377_v3 }
 0x57e   :  { %v1393_v60 = vadd.f32 %v1392_v48, %v1391_v52  ;;  %v1379_v61 = vadd.f32 %v1731_v14, %v1378_v58 }
 0x580   :  { %1734 = vtanh.f32 %v1393_v60  ;;  %v1383_v15 = vsel %vm1382_vm14, %v1731_v14, %v1379_v61 }
 0x581   :  { %v1388_v30 = vsel %vm1385_vm15, %v1387_v16, %v1383_v15 }
 0x586   :  { %v1735_v29 = vpop.eup %1734 }
 0x587   :  { %v1395_v32 = vmul.f32 %v1735_v29, %v1388_v30 }
 0x589   :  { %v1400_v47 = vmul.f32 %v1606_v10, %v1395_v32 }
 0x58b   :  { %1401 = vadd.xlane.f32.xlu2 %v1400_v47 }
 0x5fe   :  { %v1402_v49 = vpop.xlane.xlu2 %1401 }
 0x5ff   :  { %v1407_v50 = vadd.f32 %v1607_v38, %v1402_v49 }
 0x601   :  { %1409 = vst.msk [vmem:[%s2284_s6] sm:$0xff] %vm1408_vm0, %v1407_v50 }
 0x602   :  { %1414 = vsyncpa [#allocation5], 1 }

</bundles_post_ra>
